<compile_context>
chip_gen: v6e
topology: v6e:2x2x1
jax: 0.10.0
libtpu: 0.0.40
codegen_flags: <defaults>
</compile_context>

<pallas_src>
import functools
import math

import jax
import jax.numpy as jnp
from jax.experimental import pallas as pl
from jax.experimental.pallas import tpu as pltpu

LEFT_LEN = 50          # GCNN.forward hard-codes `state[:, 50:, :]`
NUM_HEADS = 8          # MultiHeadedCombination(8, dmodel)
LN_EPS = 1e-6


def gcnn_kernel(x_ref, ad_ref, w_ref, v_ref, o_ref, *, start, out_offset):
    """Single-step kernel over the whole batch.

    x_ref : (B, N, D)  bf16   concatenated [left, state]
    ad_ref: (B, N, N)  bf16   adjacency (0/1)
    w_ref : (D, 8D)    bf16   [w1 | wq | wk | wv | wo@w2 | w2 | hm_pad | hmt_pad]
    v_ref : (8, D)     f32    [b1, ln_g, ln_b, bq, bk, bv, bo@w2+b2, pad]
    o_ref : (B, N-50, D) f32  final output rows (the [:, 50:, :] slice)
    """
    bblk, n, d = x_ref.shape
    keep = n - start                     # sublane-aligned rows that feed the final slice
    m = bblk * keep

    vall = v_ref[...]                    # (8, d) f32, one vreg-row slab
    b1, ln_g, ln_b = vall[0:1], vall[1:2], vall[2:3]
    bq, bk, bv, b_out = vall[3:4], vall[4:5], vall[5:6], vall[6:7]

    # ---- first Linear on the full (bblk*n, d) slab: bf16 operands, f32 accumulation ----
    x2d = x_ref[...].reshape(bblk * n, d)                                # bf16
    x1 = jnp.dot(x2d, w_ref[:, 0:d], preferred_element_type=jnp.float32) + b1
    x1_3 = x1.reshape(bblk, n, d)                                        # f32

    # ---- degree-normalised adjacency, restricted to the surviving rows ----
    adj = ad_ref[...].astype(jnp.float32)                                # (bblk, n, n)
    colsum = jnp.maximum(jnp.sum(adj, axis=-2, keepdims=True), 1e-6)     # (bblk, 1, n)
    adj_k = adj[:, start:, :]                                            # (bblk, keep, n)
    rowsum = jnp.maximum(jnp.sum(adj_k, axis=-1, keepdims=True), 1e-6)   # (bblk, keep, 1)
    a_hat = adj_k * jax.lax.rsqrt(colsum) * jax.lax.rsqrt(rowsum)
    agg = jnp.einsum("bij,bjd->bid",
                     a_hat.astype(jnp.bfloat16), x1_3.astype(jnp.bfloat16),
                     preferred_element_type=jnp.float32).reshape(m, d)

    x1k = x1_3[:, start:, :].reshape(m, d)                               # residual / LN input

    # ---- SublayerConnection: x1 + Com(LN(x1), LN(x1), agg)  (dropout = identity) ----
    mean = jnp.mean(x1k, axis=-1, keepdims=True)
    var = jnp.sum((x1k - mean) ** 2, axis=-1, keepdims=True) / (d - 1)   # unbiased (torch.std)
    y = ln_g * (x1k - mean) / (jnp.sqrt(var) + LN_EPS) + ln_b
    yb = y.astype(jnp.bfloat16)

    # fused q|k projection: one (m, d) @ (d, 2d) dot, then lane-aligned static slices
    qk = jnp.dot(yb, w_ref[:, d:3 * d], preferred_element_type=jnp.float32)
    q = qk[:, :d] + bq
    k = qk[:, d:] + bk
    v = jnp.dot(agg.astype(jnp.bfloat16), w_ref[:, 3 * d:4 * d],
                preferred_element_type=jnp.float32) + bv

    # ---- per-head gating: softmax over {q-score, v-score} == sigmoid(s_q - s_v) ----
    # s_q - s_v = sum_head(k * (q - v)) / sqrt(d_k); the 1/sqrt(d_k) scale is folded into hm_pad.
    # hm_pad columns >= NUM_HEADS are zero -> those s columns are exactly 0 (sigmoid -> 0.5),
    # and hmt_pad rows >= NUM_HEADS are zero, so the padding contributes nothing.
    dqv = q - v
    s = jnp.dot((k * dqv).astype(jnp.bfloat16), w_ref[:, 6 * d:7 * d],
                preferred_element_type=jnp.float32)                      # (m, d)
    gate = pl.reciprocal(1.0 + jnp.exp(-s), approx=True)                 # sigmoid, EUP
    gate_full = jnp.dot(gate.astype(jnp.bfloat16), w_ref[:, 7 * d:8 * d],
                        preferred_element_type=jnp.float32)              # per-head broadcast (m, d)
    comb = v + gate_full * dqv                                           # alpha*q + (1-alpha)*v

    # ---- residual + second Linear with the pre-composed wo@w2 path:
    #      out = x1k @ w2 + comb @ (wo@w2) + (bo@w2 + b2)   (two independent MXU ops) ----
    out = (jnp.dot(x1k.astype(jnp.bfloat16), w_ref[:, 5 * d:6 * d],
                   preferred_element_type=jnp.float32)
           + jnp.dot(comb.astype(jnp.bfloat16), w_ref[:, 4 * d:5 * d],
                     preferred_element_type=jnp.float32)
           + b_out)
    out3 = out.reshape(bblk, keep, d)
    o_ref[...] = out3[:, out_offset:, :].astype(o_ref.dtype)             # rows 50: of the graph


def gcnn_forward(state, left, inputad, params):
    B, S, D = state.shape
    L = left.shape[1]
    assert L == LEFT_LEN, "module hard-codes the [:, 50:, :] slice"
    N = L + S
    start = (LEFT_LEN // 8) * 8            # 48: sublane-aligned start of the surviving rows
    out_offset = LEFT_LEN - start          # 2 : rows of the kept window that are actually emitted
    H = NUM_HEADS
    d_k = D // H
    HP = jax.lax.Precision.HIGHEST

    # glue: cat([left, state], dim=1); stored bf16 (only feeds the first bf16 matmul)
    x = jnp.concatenate([left, state], axis=1).astype(jnp.bfloat16)
    adj = inputad.astype(jnp.bfloat16)                       # 0/1 values: exact in bf16

    # pre-compose output projection . second linear (f32)
    wop = jnp.dot(params["wo"], params["w2"], precision=HP)              # (D, D)
    b_out = jnp.dot(params["bo"], params["w2"], precision=HP) + params["b2"]   # (1, D)

    # head-membership masks, zero-padded to (D, D) so they pack into the weight slab.
    # (1/sqrt(d_k) fold is exact in bf16 when d_k is a power of two, true for D=128/H=8.)
    head = jnp.arange(D, dtype=jnp.int32) // d_k
    hm_bool = (head[:, None] == jnp.arange(H, dtype=jnp.int32)[None, :]).astype(jnp.float32)
    hm_pad = jnp.zeros((D, D), jnp.float32).at[:, :H].set(hm_bool / math.sqrt(d_k))
    hmt_pad = jnp.zeros((D, D), jnp.float32).at[:H, :].set(hm_bool.T)

    # single bf16 weight slab + single f32 vector slab -> 2 parameter DMAs instead of 16
    wslab = jnp.concatenate(
        [params["w1"], params["wq"], params["wk"], params["wv"],
         wop, params["w2"], hm_pad, hmt_pad], axis=1).astype(jnp.bfloat16)     # (D, 8D)
    vslab = jnp.concatenate(
        [params["b1"], params["ln_g"], params["ln_b"],
         params["bq"], params["bk"], params["bv"], b_out,
         jnp.zeros((1, D), jnp.float32)], axis=0)                              # (8, D)

    kernel = functools.partial(gcnn_kernel, start=start, out_offset=out_offset)

    # Single grid step, whole batch per block (latency/overhead-bound shapes; everything fits
    # in < 1 MiB of VMEM on every generation).
    # NOTE: on v7x the batch could instead be split across the two TensorCores with
    # pltpu.CORE_PARALLEL / pl.core_map; grid=(1,) is the portable fallback.
    out = pl.pallas_call(
        kernel,
        out_shape=jax.ShapeDtypeStruct((B, S, D), jnp.float32),
        grid_spec=pltpu.PrefetchScalarGridSpec(
            num_scalar_prefetch=0,
            grid=(1,),
            in_specs=[pl.BlockSpec((B, N, D), lambda i: (0, 0, 0)),
                      pl.BlockSpec((B, N, N), lambda i: (0, 0, 0)),
                      pl.BlockSpec(wslab.shape, lambda i: (0, 0)),
                      pl.BlockSpec(vslab.shape, lambda i: (0, 0))],
            out_specs=pl.BlockSpec((B, S, D), lambda i: (0, 0, 0)),
        ),
        compiler_params=pltpu.CompilerParams(
            dimension_semantics=("arbitrary",)),
    )(x, adj, wslab, vslab)
    return out


def gcnn_reference(state, left, inputad, params):
    """Plain-JAX reference (mirrors the PyTorch forward in eval mode), high-precision matmuls."""
    HP = jax.lax.Precision.HIGHEST
    x = jnp.concatenate([left, state], axis=1)
    D = x.shape[-1]
    x1 = jnp.dot(x, params["w1"], precision=HP) + params["b1"]
    rowsum = jnp.maximum(inputad.sum(-1, keepdims=True), 1e-6)
    colsum = jnp.maximum(inputad.sum(-2, keepdims=True), 1e-6)
    a_hat = (1.0 / jnp.sqrt(colsum)) * inputad * (1.0 / jnp.sqrt(rowsum))
    agg = jnp.einsum("bij,bjd->bid", a_hat, x1, precision=HP)
    mean = x1.mean(-1, keepdims=True)
    var = ((x1 - mean) ** 2).sum(-1, keepdims=True) / (D - 1)
    y = params["ln_g"] * (x1 - mean) / (jnp.sqrt(var) + LN_EPS) + params["ln_b"]
    q = jnp.dot(y, params["wq"], precision=HP) + params["bq"]
    k = jnp.dot(y, params["wk"], precision=HP) + params["bk"]
    v = jnp.dot(agg, params["wv"], precision=HP) + params["bv"]
    B, N, _ = q.shape
    h, dk = NUM_HEADS, D // NUM_HEADS
    qh, kh, vh = (t.reshape(B, N, h, dk) for t in (q, k, v))
    sq = (kh * qh).sum(-1) / math.sqrt(dk)
    sv = (kh * vh).sum(-1) / math.sqrt(dk)
    w = jax.nn.softmax(jnp.stack([sq, sv], -1), axis=-1)
    comb = (w[..., 0:1] * qh + w[..., 1:2] * vh).reshape(B, N, D)
    com = jnp.dot(comb, params["wo"], precision=HP) + params["bo"]
    out = jnp.dot(x1 + com, params["w2"], precision=HP) + params["b2"]
    return out[:, LEFT_LEN:, :]


def init_params(key, dmodel):
    bound = 1.0 / math.sqrt(dmodel)
    names = ["w1", "wq", "wk", "wv", "wo", "w2"]
    keys = jax.random.split(key, 2 * len(names))
    params = {}
    for i, n in enumerate(names):
        params[n] = jax.random.uniform(keys[2 * i], (dmodel, dmodel),
                                       jnp.float32, -bound, bound)
        params["b" + n[1:]] = jax.random.uniform(keys[2 * i + 1], (1, dmodel),
                                                 jnp.float32, -bound, bound)
    params["ln_g"] = jnp.ones((1, dmodel), jnp.float32)    # LayerNorm default init
    params["ln_b"] = jnp.zeros((1, dmodel), jnp.float32)
    return params


if __name__ == "__main__":
    B, S_STATE, DMODEL = 4, 14, 128           # total nodes N = 50 + 14 = 64
    key = jax.random.PRNGKey(0)
    k_state, k_left, k_adj, k_par = jax.random.split(key, 4)

    state = jax.random.normal(k_state, (B, S_STATE, DMODEL), jnp.float32)
    left = jax.random.normal(k_left, (B, LEFT_LEN, DMODEL), jnp.float32)
    N = LEFT_LEN + S_STATE
    inputad = (jax.random.uniform(k_adj, (B, N, N)) < 0.3).astype(jnp.float32)
    params = init_params(k_par, DMODEL)

    out = jax.block_until_ready(gcnn_forward(state, left, inputad, params))
    ref = jax.block_until_ready(gcnn_reference(state, left, inputad, params))

    assert out.shape == (B, S_STATE, DMODEL), out.shape
    assert jnp.allclose(out, ref, rtol=2e-2, atol=2e-2), \
        float(jnp.max(jnp.abs(out - ref)))
    print("KERNEL_OK")
</pallas_src>

<mosaic_0001>
module attributes {stable_mosaic.version = 11 : i64} {
  func.func @gcnn_kernel(%arg0: i32, %arg1: memref<4x64x128xbf16, #tpu.memory_space<vmem>>, %arg2: memref<4x64x64xbf16, #tpu.memory_space<vmem>>, %arg3: memref<128x1024xbf16, #tpu.memory_space<vmem>>, %arg4: memref<8x128xf32, #tpu.memory_space<vmem>>, %arg5: memref<4x14x128xf32, #tpu.memory_space<vmem>>) attributes {dimension_semantics = [#tpu.dimension_semantics<arbitrary>], iteration_bounds = array<i64: 1>, scalar_prefetch = 0 : i64, scratch_operands = 0 : i64, tpu.core_type = #tpu.core_type<tc>, window_params = [{pipeline_mode = #tpu.pipeline_mode<synchronous>, transform_indices = @transform_0, window_bounds = array<i64: 4, 64, 128>}, {pipeline_mode = #tpu.pipeline_mode<synchronous>, transform_indices = @transform_1, window_bounds = array<i64: 4, 64, 64>}, {pipeline_mode = #tpu.pipeline_mode<synchronous>, transform_indices = @transform_2, window_bounds = array<i64: 128, 1024>}, {pipeline_mode = #tpu.pipeline_mode<synchronous>, transform_indices = @transform_3, window_bounds = array<i64: 8, 128>}, {pipeline_mode = #tpu.pipeline_mode<synchronous>, transform_indices = @transform_4, window_bounds = array<i64: 4, 14, 128>}]} {
    %c0 = arith.constant 0 : index
    %c0_0 = arith.constant 0 : index
    %0 = vector.load %arg4[%c0, %c0_0] : memref<8x128xf32, #tpu.memory_space<vmem>>, vector<8x128xf32>
    %1 = vector.extract_strided_slice %0 {offsets = [0, 0], sizes = [1, 128], strides = [1, 1]} : vector<8x128xf32> to vector<1x128xf32>
    %2 = vector.extract_strided_slice %0 {offsets = [1, 0], sizes = [1, 128], strides = [1, 1]} : vector<8x128xf32> to vector<1x128xf32>
    %3 = vector.extract_strided_slice %0 {offsets = [2, 0], sizes = [1, 128], strides = [1, 1]} : vector<8x128xf32> to vector<1x128xf32>
    %4 = vector.extract_strided_slice %0 {offsets = [3, 0], sizes = [1, 128], strides = [1, 1]} : vector<8x128xf32> to vector<1x128xf32>
    %5 = vector.extract_strided_slice %0 {offsets = [4, 0], sizes = [1, 128], strides = [1, 1]} : vector<8x128xf32> to vector<1x128xf32>
    %6 = vector.extract_strided_slice %0 {offsets = [5, 0], sizes = [1, 128], strides = [1, 1]} : vector<8x128xf32> to vector<1x128xf32>
    %7 = vector.extract_strided_slice %0 {offsets = [6, 0], sizes = [1, 128], strides = [1, 1]} : vector<8x128xf32> to vector<1x128xf32>
    %c0_1 = arith.constant 0 : index
    %c0_2 = arith.constant 0 : index
    %c0_3 = arith.constant 0 : index
    %8 = vector.load %arg1[%c0_1, %c0_2, %c0_3] : memref<4x64x128xbf16, #tpu.memory_space<vmem>>, vector<4x64x128xbf16>
    %9 = vector.shape_cast %8 : vector<4x64x128xbf16> to vector<256x128xbf16>
    %c0_4 = arith.constant 0 : index
    %c0_5 = arith.constant 0 : index
    %10 = vector.load %arg3[%c0_4, %c0_5] : memref<128x1024xbf16, #tpu.memory_space<vmem>>, vector<128x128xbf16>
    %cst = arith.constant dense<0.000000e+00> : vector<256x128xf32>
    %11 = tpu.matmul %9, %10, %cst {dimension_numbers = #tpu.dot_dimension_numbers<[1], [0], [0], [1], [0, 0, 1, 1], [], []>} : vector<256x128xbf16>, vector<128x128xbf16>, vector<256x128xf32> -> vector<256x128xf32>
    %12 = vector.broadcast %1 : vector<1x128xf32> to vector<256x128xf32>
    %13 = arith.addf %11, %12 : vector<256x128xf32>
    %14 = vector.shape_cast %13 : vector<256x128xf32> to vector<4x64x128xf32>
    %c0_6 = arith.constant 0 : index
    %c0_7 = arith.constant 0 : index
    %c0_8 = arith.constant 0 : index
    %15 = vector.load %arg2[%c0_6, %c0_7, %c0_8] : memref<4x64x64xbf16, #tpu.memory_space<vmem>>, vector<4x64x64xbf16>
    %16 = arith.extf %15 : vector<4x64x64xbf16> to vector<4x64x64xf32>
    %cst_9 = arith.constant dense<0.000000e+00> : vector<4x64xf32>
    %17 = vector.multi_reduction <add>, %16, %cst_9 [1] : vector<4x64x64xf32> to vector<4x64xf32>
    %18 = vector.shape_cast %17 : vector<4x64xf32> to vector<4x1x64xf32>
    %cst_10 = arith.constant 9.99999997E-7 : f32
    %19 = vector.broadcast %cst_10 : f32 to vector<4x1x64xf32>
    %20 = arith.maximumf %18, %19 : vector<4x1x64xf32>
    %21 = vector.extract_strided_slice %16 {offsets = [0, 48, 0], sizes = [4, 16, 64], strides = [1, 1, 1]} : vector<4x64x64xf32> to vector<4x16x64xf32>
    %cst_11 = arith.constant dense<0.000000e+00> : vector<4x16xf32>
    %22 = vector.multi_reduction <add>, %21, %cst_11 [2] : vector<4x16x64xf32> to vector<4x16xf32>
    %23 = vector.shape_cast %22 : vector<4x16xf32> to vector<4x16x1xf32>
    %cst_12 = arith.constant 9.99999997E-7 : f32
    %24 = vector.broadcast %cst_12 : f32 to vector<4x16x1xf32>
    %25 = arith.maximumf %23, %24 : vector<4x16x1xf32>
    %26 = math.rsqrt %20 : vector<4x1x64xf32>
    %27 = vector.broadcast %26 : vector<4x1x64xf32> to vector<4x16x64xf32>
    %28 = arith.mulf %21, %27 : vector<4x16x64xf32>
    %29 = math.rsqrt %25 : vector<4x16x1xf32>
    %30 = vector.broadcast %29 : vector<4x16x1xf32> to vector<4x16x64xf32>
    %31 = arith.mulf %28, %30 : vector<4x16x64xf32>
    %32 = arith.truncf %31 : vector<4x16x64xf32> to vector<4x16x64xbf16>
    %33 = arith.truncf %14 : vector<4x64x128xf32> to vector<4x64x128xbf16>
    "tpu.trace_start"() <{level = 10 : i32, message = "bij,bjd->bid"}> : () -> ()
    %cst_13 = arith.constant dense<0.000000e+00> : vector<4x16x128xf32>
    %34 = tpu.matmul %32, %33, %cst_13 {dimension_numbers = #tpu.dot_dimension_numbers<[2], [1], [1], [2], [0, 0, 0, 1, 1, 2], [0], [0]>} : vector<4x16x64xbf16>, vector<4x64x128xbf16>, vector<4x16x128xf32> -> vector<4x16x128xf32>
    "tpu.trace_stop"() : () -> ()
    %35 = vector.shape_cast %34 : vector<4x16x128xf32> to vector<64x128xf32>
    %36 = vector.extract_strided_slice %14 {offsets = [0, 48, 0], sizes = [4, 16, 128], strides = [1, 1, 1]} : vector<4x64x128xf32> to vector<4x16x128xf32>
    %37 = vector.shape_cast %36 : vector<4x16x128xf32> to vector<64x128xf32>
    %cst_14 = arith.constant dense<0.000000e+00> : vector<64xf32>
    %38 = vector.multi_reduction <add>, %37, %cst_14 [1] : vector<64x128xf32> to vector<64xf32>
    %39 = vector.shape_cast %38 : vector<64xf32> to vector<64x1xf32>
    %cst_15 = arith.constant 1.280000e+02 : f32
    %40 = vector.broadcast %cst_15 : f32 to vector<64x1xf32>
    %41 = arith.divf %39, %40 : vector<64x1xf32>
    %42 = vector.broadcast %41 : vector<64x1xf32> to vector<64x128xf32>
    %43 = arith.subf %37, %42 : vector<64x128xf32>
    %44 = arith.mulf %43, %43 : vector<64x128xf32>
    %cst_16 = arith.constant dense<0.000000e+00> : vector<64xf32>
    %45 = vector.multi_reduction <add>, %44, %cst_16 [1] : vector<64x128xf32> to vector<64xf32>
    %46 = vector.shape_cast %45 : vector<64xf32> to vector<64x1xf32>
    %cst_17 = arith.constant 1.270000e+02 : f32
    %47 = vector.broadcast %cst_17 : f32 to vector<64x1xf32>
    %48 = arith.divf %46, %47 : vector<64x1xf32>
    %49 = vector.broadcast %41 : vector<64x1xf32> to vector<64x128xf32>
    %50 = arith.subf %37, %49 : vector<64x128xf32>
    %51 = vector.broadcast %2 : vector<1x128xf32> to vector<64x128xf32>
    %52 = arith.mulf %51, %50 : vector<64x128xf32>
    %53 = math.sqrt %48 : vector<64x1xf32>
    %cst_18 = arith.constant 9.99999997E-7 : f32
    %54 = vector.broadcast %cst_18 : f32 to vector<64x1xf32>
    %55 = arith.addf %53, %54 : vector<64x1xf32>
    %56 = vector.broadcast %55 : vector<64x1xf32> to vector<64x128xf32>
    %57 = arith.divf %52, %56 : vector<64x128xf32>
    %58 = vector.broadcast %3 : vector<1x128xf32> to vector<64x128xf32>
    %59 = arith.addf %57, %58 : vector<64x128xf32>
    %60 = arith.truncf %59 : vector<64x128xf32> to vector<64x128xbf16>
    %c0_19 = arith.constant 0 : index
    %c128 = arith.constant 128 : index
    %61 = vector.load %arg3[%c0_19, %c128] : memref<128x1024xbf16, #tpu.memory_space<vmem>>, vector<128x256xbf16>
    %cst_20 = arith.constant dense<0.000000e+00> : vector<64x256xf32>
    %62 = tpu.matmul %60, %61, %cst_20 {dimension_numbers = #tpu.dot_dimension_numbers<[1], [0], [0], [1], [0, 0, 1, 1], [], []>} : vector<64x128xbf16>, vector<128x256xbf16>, vector<64x256xf32> -> vector<64x256xf32>
    %63 = vector.extract_strided_slice %62 {offsets = [0, 0], sizes = [64, 128], strides = [1, 1]} : vector<64x256xf32> to vector<64x128xf32>
    %64 = vector.broadcast %4 : vector<1x128xf32> to vector<64x128xf32>
    %65 = arith.addf %63, %64 : vector<64x128xf32>
    %66 = vector.extract_strided_slice %62 {offsets = [0, 128], sizes = [64, 128], strides = [1, 1]} : vector<64x256xf32> to vector<64x128xf32>
    %67 = vector.broadcast %5 : vector<1x128xf32> to vector<64x128xf32>
    %68 = arith.addf %66, %67 : vector<64x128xf32>
    %69 = arith.truncf %35 : vector<64x128xf32> to vector<64x128xbf16>
    %c0_21 = arith.constant 0 : index
    %c384 = arith.constant 384 : index
    %70 = vector.load %arg3[%c0_21, %c384] : memref<128x1024xbf16, #tpu.memory_space<vmem>>, vector<128x128xbf16>
    %cst_22 = arith.constant dense<0.000000e+00> : vector<64x128xf32>
    %71 = tpu.matmul %69, %70, %cst_22 {dimension_numbers = #tpu.dot_dimension_numbers<[1], [0], [0], [1], [0, 0, 1, 1], [], []>} : vector<64x128xbf16>, vector<128x128xbf16>, vector<64x128xf32> -> vector<64x128xf32>
    %72 = vector.broadcast %6 : vector<1x128xf32> to vector<64x128xf32>
    %73 = arith.addf %71, %72 : vector<64x128xf32>
    %74 = arith.subf %65, %73 : vector<64x128xf32>
    %75 = arith.mulf %68, %74 : vector<64x128xf32>
    %76 = arith.truncf %75 : vector<64x128xf32> to vector<64x128xbf16>
    %c0_23 = arith.constant 0 : index
    %c768 = arith.constant 768 : index
    %77 = vector.load %arg3[%c0_23, %c768] : memref<128x1024xbf16, #tpu.memory_space<vmem>>, vector<128x128xbf16>
    %cst_24 = arith.constant dense<0.000000e+00> : vector<64x128xf32>
    %78 = tpu.matmul %76, %77, %cst_24 {dimension_numbers = #tpu.dot_dimension_numbers<[1], [0], [0], [1], [0, 0, 1, 1], [], []>} : vector<64x128xbf16>, vector<128x128xbf16>, vector<64x128xf32> -> vector<64x128xf32>
    %cst_25 = arith.constant 0.000000e+00 : f32
    %79 = vector.broadcast %cst_25 : f32 to vector<64x128xf32>
    %80 = arith.subf %79, %78 : vector<64x128xf32>
    %81 = math.exp %80 : vector<64x128xf32>
    %cst_26 = arith.constant 1.000000e+00 : f32
    %82 = vector.broadcast %cst_26 : f32 to vector<64x128xf32>
    %83 = arith.addf %82, %81 : vector<64x128xf32>
    %84 = tpu.reciprocal %83 {approx = true} : vector<64x128xf32> -> vector<64x128xf32>
    %85 = arith.truncf %84 : vector<64x128xf32> to vector<64x128xbf16>
    %c0_27 = arith.constant 0 : index
    %c896 = arith.constant 896 : index
    %86 = vector.load %arg3[%c0_27, %c896] : memref<128x1024xbf16, #tpu.memory_space<vmem>>, vector<128x128xbf16>
    %cst_28 = arith.constant dense<0.000000e+00> : vector<64x128xf32>
    %87 = tpu.matmul %85, %86, %cst_28 {dimension_numbers = #tpu.dot_dimension_numbers<[1], [0], [0], [1], [0, 0, 1, 1], [], []>} : vector<64x128xbf16>, vector<128x128xbf16>, vector<64x128xf32> -> vector<64x128xf32>
    %88 = arith.mulf %87, %74 : vector<64x128xf32>
    %89 = arith.addf %73, %88 : vector<64x128xf32>
    %90 = arith.truncf %37 : vector<64x128xf32> to vector<64x128xbf16>
    %c0_29 = arith.constant 0 : index
    %c640 = arith.constant 640 : index
    %91 = vector.load %arg3[%c0_29, %c640] : memref<128x1024xbf16, #tpu.memory_space<vmem>>, vector<128x128xbf16>
    %cst_30 = arith.constant dense<0.000000e+00> : vector<64x128xf32>
    %92 = tpu.matmul %90, %91, %cst_30 {dimension_numbers = #tpu.dot_dimension_numbers<[1], [0], [0], [1], [0, 0, 1, 1], [], []>} : vector<64x128xbf16>, vector<128x128xbf16>, vector<64x128xf32> -> vector<64x128xf32>
    %93 = arith.truncf %89 : vector<64x128xf32> to vector<64x128xbf16>
    %c0_31 = arith.constant 0 : index
    %c512 = arith.constant 512 : index
    %94 = vector.load %arg3[%c0_31, %c512] : memref<128x1024xbf16, #tpu.memory_space<vmem>>, vector<128x128xbf16>
    %cst_32 = arith.constant dense<0.000000e+00> : vector<64x128xf32>
    %95 = tpu.matmul %93, %94, %cst_32 {dimension_numbers = #tpu.dot_dimension_numbers<[1], [0], [0], [1], [0, 0, 1, 1], [], []>} : vector<64x128xbf16>, vector<128x128xbf16>, vector<64x128xf32> -> vector<64x128xf32>
    %96 = arith.addf %92, %95 : vector<64x128xf32>
    %97 = vector.broadcast %7 : vector<1x128xf32> to vector<64x128xf32>
    %98 = arith.addf %96, %97 : vector<64x128xf32>
    %99 = vector.shape_cast %98 : vector<64x128xf32> to vector<4x16x128xf32>
    %100 = vector.extract_strided_slice %99 {offsets = [0, 2, 0], sizes = [4, 14, 128], strides = [1, 1, 1]} : vector<4x16x128xf32> to vector<4x14x128xf32>
    %c0_33 = arith.constant 0 : index
    %c0_34 = arith.constant 0 : index
    %c0_35 = arith.constant 0 : index
    %101 = vector.load %arg5[%c0_33, %c0_34, %c0_35] : memref<4x14x128xf32, #tpu.memory_space<vmem>>, vector<4x14x128xf32>
    tpu.vector_store %arg5[%c0_33, %c0_34, %c0_35], %100 {strides = array<i32>} : memref<4x14x128xf32, #tpu.memory_space<vmem>>, vector<4x14x128xf32>,
    return
  }
  func.func @transform_0(%arg0: i32) -> (i32, i32, i32) {
    %c0_i32 = arith.constant 0 : i32
    %c0_i32_0 = arith.constant 0 : i32
    %c0_i32_1 = arith.constant 0 : i32
    %c0_i32_2 = arith.constant 0 : i32
    return %c0_i32, %c0_i32_0, %c0_i32_1 : i32, i32, i32
  }
  func.func @transform_1(%arg0: i32) -> (i32, i32, i32) {
    %c0_i32 = arith.constant 0 : i32
    %c0_i32_0 = arith.constant 0 : i32
    %c0_i32_1 = arith.constant 0 : i32
    %c0_i32_2 = arith.constant 0 : i32
    return %c0_i32, %c0_i32_0, %c0_i32_1 : i32, i32, i32
  }
  func.func @transform_2(%arg0: i32) -> (i32, i32) {
    %c0_i32 = arith.constant 0 : i32
    %c0_i32_0 = arith.constant 0 : i32
    %c0_i32_1 = arith.constant 0 : i32
    return %c0_i32, %c0_i32_0 : i32, i32
  }
  func.func @transform_3(%arg0: i32) -> (i32, i32) {
    %c0_i32 = arith.constant 0 : i32
    %c0_i32_0 = arith.constant 0 : i32
    %c0_i32_1 = arith.constant 0 : i32
    return %c0_i32, %c0_i32_0 : i32, i32
  }
  func.func @transform_4(%arg0: i32) -> (i32, i32, i32) {
    %c0_i32 = arith.constant 0 : i32
    %c0_i32_0 = arith.constant 0 : i32
    %c0_i32_1 = arith.constant 0 : i32
    %c0_i32_2 = arith.constant 0 : i32
    return %c0_i32, %c0_i32_0, %c0_i32_1 : i32, i32, i32
  }
}

</mosaic_0001>

<bundles_post_ra>
// kernel: tpu_custom_call.1
= control target key start
LH: loop header
LB: loop body
LE: loop exit
PB: predicated region body
PF: predicated region fallthrough
CT: control target
= control target key end

     0   :  { %9 = vsyncpa [#allocation3], 0  ;;  %s3139_s0 = inlined_call_operand.hbm [shape: bf16[4,64,128], index: 0, kind: input, shape index: {}]   ;;  %s3140_s1 = inlined_call_operand.hbm [shape: bf16[4,64,64], index: 1, kind: input, shape index: {}]   ;;  %s3141_s2 = inlined_call_operand.hbm [shape: bf16[128,1024], index: 2, kind: input, shape index: {}]   ;;  %s3142_s3 = inlined_call_operand.hbm [shape: f32[8,128], index: 3, kind: input, shape index: {}]   ;;  %s3143_s4 = inlined_call_operand.vmem [shape: f32[4,14,128], index: 4, kind: output, shape index: {}]  }
   0x1   :  { %10 = vsyncpa [#allocation5], 0 }
   0x2   :  { %11 = vsyncpa [#allocation8], 0  ;;  %s2646_s15 = smov [#allocation4]   ;;  %s2647_s17 = smov [#allocation2]  }
   0x3   :  { %s29_s16 = sshll.u32 %s2646_s15, 4  ;;  %s17_s18 = sshll.u32 %s2647_s17, 4  ;;  %s30_s16 = int_to_ptr.vmem [resolvable:$true] %s29_s16  ;;  %s18_s18 = int_to_ptr.vmem [resolvable:$true] %s17_s18 }
   0x4   :  { %s2568_s19 = scalar_lea.vmem %s30_s16, 2048  ;;  %p2573_p1 = scmp.lt.s32.totalorder %s30_s16, %s30_s16 }
   0x5   :  { %p2569_p0 = scmp.ne.s32.totalorder %s30_s16, %s2568_s19  ;;  %p2574_p2 = scmp.lt.s32.totalorder %s2568_s19, %s2568_s19 }
   0x7   :  { %p2575_p3 = por %p2574_p2, %p2573_p1 }
   0x9   :  { %p2576_p4 = pnand %p2575_p3, %p2569_p0 }
   0xb   :  { %2579 = shalt.err (!%p2576_p4)
}
   0xc   :  { %s2648_s20 = smov 64   ;;  %s2649_s21 = smov 4  }
   0xd   :  { %35 = dma.hbm_to_vmem [thread:$0]  %s3140_s1, 2048, %s30_s16, [#allocation5], %s2648_s20, %s2648_s20, %s2649_s21  }
   0xe   :  { %s2588_s24 = scalar_lea.vmem %s18_s18, 2048  ;;  %p2593_p6 = scmp.lt.s32.totalorder %s18_s18, %s18_s18 }
   0xf   :  { %p2589_p5 = scmp.ne.s32.totalorder %s18_s18, %s2588_s24  ;;  %p2594_p7 = scmp.lt.s32.totalorder %s2588_s24, %s2588_s24 }
  0x11   :  { %p2595_p8 = por %p2594_p7, %p2593_p6 }
  0x13   :  { %p2596_p9 = pnand %p2595_p8, %p2589_p5 }
  0x15   :  { %2599 = shalt.err (!%p2596_p9)
}
  0x16   :  { %23 = dma.hbm_to_vmem [thread:$0]  %s3139_s0, 2048, %s18_s18, [#allocation3], %s2648_s20, %s2648_s20, %s2649_s21  }
  0x17   :  { %s2650_s27 = smov [#allocation6]  }
  0x18   :  { %s41_s28 = sshll.u32 %s2650_s27, 4  ;;  %s42_s28 = int_to_ptr.vmem [resolvable:$true] %s41_s28 }
  0x19   :  { %s2608_s29 = scalar_lea.vmem %s42_s28, 8192  ;;  %p2613_p11 = scmp.lt.s32.totalorder %s42_s28, %s42_s28 }
  0x1a   :  { %p2609_p10 = scmp.ne.s32.totalorder %s42_s28, %s2608_s29  ;;  %p2614_p12 = scmp.lt.s32.totalorder %s2608_s29, %s2608_s29 }
  0x1c   :  { %p2615_p13 = por %p2614_p12, %p2613_p11 }
  0x1e   :  { %p2616_p0 = pnand %p2615_p13, %p2609_p10 }
  0x20   :  { %2619 = shalt.err (!%p2616_p0)
}
  0x21   :  { %s2651_s1 = smov 512   ;;  %s2652_s30 = smov 32  }
  0x22   :  { %47 = dma.hbm_to_vmem [thread:$0]  %s3141_s2, 8192, %s42_s28, [#allocation5], %s2651_s1, %s2651_s1, %s2652_s30  }
  0x23   :  { %s2653_s7 = smov [#allocation7]  }
  0x24   :  { %s54_s8 = sshll.u32 %s2653_s7, 4  ;;  %s55_s8 = int_to_ptr.vmem [resolvable:$true] %s54_s8 }
  0x25   :  { %s2628_s0 = scalar_lea.vmem %s55_s8, 128  ;;  %p2633_p2 = scmp.lt.s32.totalorder %s55_s8, %s55_s8 }
  0x26   :  { %p2629_p1 = scmp.ne.s32.totalorder %s55_s8, %s2628_s0  ;;  %p2634_p3 = scmp.lt.s32.totalorder %s2628_s0, %s2628_s0 }
  0x28   :  { %p2635_p4 = por %p2634_p3, %p2633_p2 }
  0x2a   :  { %p2636_p5 = pnand %p2635_p4, %p2629_p1 }
  0x2c   :  { %2639 = shalt.err (!%p2636_p5)
}
  0x2d   :  { %57 = dma.hbm_to_vmem [thread:$0]  %s3142_s3, 128, %s55_s8, [#allocation8]  }
  0x2e   :  { %2640 = dma.done.wait [#allocation3], 2048  }
  0x2f   :  { %2641 = vsyncadd [#allocation3], 4294965248 }
  0x30   :  { %2642 = dma.done.wait [#allocation5], 10240  }
  0x31   :  { %2643 = vsyncadd [#allocation5], 4294957056 }
  0x32   :  { %2644 = dma.done.wait [#allocation8], 128  }
  0x33   :  { %2645 = vsyncadd [#allocation8], 4294967168  ;;  %v118_v0 = vld [vmem:[#allocation6 + $0x1c0] sm:$0xf]  ;;  %v2694_v24 = vld [vmem:[#allocation4 + $0x18] sm:$0xff]   ;;  %vm493_vm0 = vcmask 523264  }
  0x34   :  { %v119_v1 = vld [vmem:[#allocation6 + $0x1e0] sm:$0xf]  ;;  %v2059_v26 = vunpack.c.l.bf16 %v2694_v24  ;;  %v2109_v29 = vld [vmem:[#allocation4 + $0x8] sm:$0xff]   ;;  %v2110_v30 = vld [vmem:[#allocation4 + $0x10] sm:$0xff]   ;;  %v2060_v31 = vunpack.c.h.bf16 %v2694_v24  ;;  %vm2655_vm1 = vmmov 0  }
  0x35   :  { %v116_v2 = vld [vmem:[#allocation6 + $0x180] sm:$0xf]  ;;  %v1984_v3 = vcombine.low %v118_v0, %v119_v1  ;;  %v2051_v32 = vunpack.c.l.bf16 %v2109_v29  ;;  %v2052_v33 = vunpack.c.h.bf16 %v2109_v29  ;;  %v2055_v34 = vunpack.c.l.bf16 %v2110_v30  ;;  %v2698_v35 = vld [vmem:[#allocation4 + $0x38] sm:$0xff]   ;;  %v2113_v41 = vld [vmem:[#allocation4 + $0x28] sm:$0xff]  }
  0x36   :  { %v117_v4 = vld [vmem:[#allocation6 + $0x1a0] sm:$0xf]  ;;  %v505_v38 = vsel %vm493_vm0, %v2059_v26, 0.0  ;;  %v2056_v42 = vunpack.c.h.bf16 %v2110_v30  ;;  %v507_v45 = vsel %vm493_vm0, %v2060_v31, 0.0  ;;  %v2114_v46 = vld [vmem:[#allocation4 + $0x30] sm:$0xff]   ;;  %v2075_v48 = vunpack.c.l.bf16 %v2698_v35  ;;  %v2712_v55 = vld [vmem:[#allocation4 + $0x58] sm:$0xff]  }
  0x37   :  { %v1983_v5 = vcombine.low %v116_v2, %v117_v4  ;;  %v114_v6 = vld [vmem:[#allocation6 + $0x140] sm:$0xf]  ;;  %2228 = vmatprep.subr.bf16.mxu0 %v1984_v3  ;;  %582 = vadd.xlane.f32.xlu0 %v505_v38  ;;  %v497_v44 = vsel %vm493_vm0, %v2051_v32, 0.0  ;;  %v499_v47 = vsel %vm493_vm0, %v2052_v33, 0.0  ;;  %v501_v52 = vsel %vm493_vm0, %v2055_v34, 0.0  ;;  %v2117_v1 = vld [vmem:[#allocation4 + $0x48] sm:$0xff]  }
  0x38   :  { %v115_v7 = vld [vmem:[#allocation6 + $0x160] sm:$0xf]  ;;  %2229 = vmatpush3.bf16.msra.mxu0 %v1984_v3  ;;  %v2067_v53 = vunpack.c.l.bf16 %v2113_v41  ;;  %v2068_v54 = vunpack.c.h.bf16 %v2113_v41  ;;  %v526_v56 = vsel %vm493_vm0, %v2075_v48, 0.0  ;;  %v2071_v57 = vunpack.c.l.bf16 %v2114_v46 }
  0x39   :  { %v112_v8 = vld [vmem:[#allocation6 + $0x100] sm:$0xf]  ;;  %2230 = vmatprep.subr.bf16.mxu0 %v1983_v5  ;;  %v1982_v9 = vcombine.low %v114_v6, %v115_v7  ;;  %v2072_v62 = vunpack.c.h.bf16 %v2114_v46  ;;  %v503_v2 = vsel %vm493_vm0, %v2056_v42, 0.0  ;;  %586 = vadd.xlane.f32.xlu1 %v526_v56  ;;  %v2076_v4 = vunpack.c.h.bf16 %v2698_v35  ;;  %v2118_v6 = vld [vmem:[#allocation4 + $0x50] sm:$0xff]   ;;  %v2456_v7 = vld [vmem:[#allocation2 + $0x8] sm:$0xff]  }
  0x3a   :  { %v113_v10 = vld [vmem:[#allocation6 + $0x120] sm:$0xf]  ;;  %v518_v0 = vsel %vm493_vm0, %v2067_v53, 0.0  ;;  %v520_v3 = vsel %vm493_vm0, %v2068_v54, 0.0  ;;  %v2088_v32 = vunpack.c.h.bf16 %v2118_v6 }
  0x3b   :  { %v2455_v11 = vld [vmem:[#allocation2] sm:$0xff]   ;;  %v1981_v12 = vcombine.low %v112_v8, %v113_v10  ;;  %584 = vadd.xlane.f32.xlu0 %v507_v45 }
  0x3c   :  { %2231 = vmatpush3.bf16.msra.mxu0 %v1983_v5  ;;  %2244 = vmatprep.mubr.bf16.mxu0 %v2455_v11  ;;  %v110_v13 = vld [vmem:[#allocation6 + $0xc0] sm:$0xf]  ;;  %v2092_v5 = vunpack.c.h.bf16 %v2712_v55  ;;  %v545_v46 = vsel %vm493_vm0, %v2088_v32, 0.0 }
  0x3d   :  { %2232 = vmatprep.subr.bf16.mxu0 %v1982_v9  ;;  %v111_v14 = vld [vmem:[#allocation6 + $0xe0] sm:$0xf] }
  0x3e   :  { %v1980_v15 = vcombine.low %v110_v13, %v111_v14  ;;  %v108_v16 = vld [vmem:[#allocation6 + $0x80] sm:$0xf]  ;;  %v522_v13 = vsel %vm493_vm0, %v2071_v57, 0.0  ;;  %v528_v14 = vsel %vm493_vm0, %v2076_v4, 0.0  ;;  %v549_v29 = vsel %vm493_vm0, %v2092_v5, 0.0 }
  0x3f   :  { %v109_v17 = vld [vmem:[#allocation6 + $0xa0] sm:$0xf]  ;;  %588 = vadd.xlane.f32.xlu1 %v528_v14 }
  0x40   :  { %2233 = vmatpush3.bf16.msra.mxu0 %v1982_v9  ;;  %v1979_v18 = vcombine.low %v108_v16, %v109_v17  ;;  %v106_v19 = vld [vmem:[#allocation6 + $0x40] sm:$0xf]  ;;  %v2084_v16 = vunpack.c.h.bf16 %v2117_v1 }
  0x41   :  { %2234 = vmatprep.subr.bf16.mxu0 %v1981_v12  ;;  %v107_v20 = vld [vmem:[#allocation6 + $0x60] sm:$0xf] }
  0x42   :  { %v104_v21 = vld [vmem:[#allocation6] sm:$0xf]  ;;  %v1978_v22 = vcombine.low %v106_v19, %v107_v20  ;;  %v524_v19 = vsel %vm493_vm0, %v2072_v62, 0.0  ;;  %v2087_v20 = vunpack.c.l.bf16 %v2118_v6  ;;  %v541_v33 = vsel %vm493_vm0, %v2084_v16, 0.0  ;;  %v2465_v16 = vld [vmem:[#allocation2 + $0x50] sm:$0xff]  }
  0x43   :  { %v105_v23 = vld [vmem:[#allocation6 + $0x20] sm:$0xf]  ;;  %592 = vadd.xlane.f32.xlu1 %v549_v29 }
  0x44   :  { %2235 = vmatpush3.bf16.msra.mxu0 %v1981_v12  ;;  %v2046_v25 = vld [vmem:[#allocation4] sm:$0xff]   ;;  %v1977_v37 = vcombine.low %v104_v21, %v105_v23  ;;  %v2457_v12 = vld [vmem:[#allocation2 + $0x10] sm:$0xff]   ;;  %v2091_v21 = vunpack.c.l.bf16 %v2712_v55 }
  0x45   :  { %2236 = vmatprep.subr.bf16.mxu0 %v1980_v15  ;;  %v2047_v27 = vunpack.c.l.bf16 %v2046_v25  ;;  %v2048_v28 = vunpack.c.h.bf16 %v2046_v25  ;;  %v2112_v36 = vld [vmem:[#allocation4 + $0x20] sm:$0xff]  }
  0x46   :  { %v2063_v49 = vunpack.c.l.bf16 %v2112_v36  ;;  %v2064_v50 = vunpack.c.h.bf16 %v2112_v36  ;;  %v2116_v60 = vld [vmem:[#allocation4 + $0x40] sm:$0xff]   ;;  %v547_v34 = vsel %vm493_vm0, %v2091_v21, 0.0 }
  0x47   :  { %v494_v39 = vsel %vm493_vm0, %v2047_v27, 0.0  ;;  %v495_v40 = vsel %vm493_vm0, %v2048_v28, 0.0  ;;  %v2079_v10 = vunpack.c.l.bf16 %v2116_v60  ;;  %v2080_v11 = vunpack.c.h.bf16 %v2116_v60  ;;  %590 = vadd.xlane.f32.xlu0 %v547_v34 }
  0x48   :  { %2237 = vmatpush3.bf16.msra.mxu0 %v1980_v15  ;;  %v496_v43 = vadd.f32 %v495_v40, %v494_v39  ;;  %v515_v58 = vsel %vm493_vm0, %v2063_v49, 0.0  ;;  %v516_v59 = vsel %vm493_vm0, %v2064_v50, 0.0  ;;  %v2083_v15 = vunpack.c.l.bf16 %v2117_v1  ;;  %v2458_v40 = vld [vmem:[#allocation2 + $0x18] sm:$0xff]  }
  0x49   :  { %2238 = vmatprep.subr.bf16.mxu0 %v1979_v18  ;;  %v517_v63 = vadd.f32 %v516_v59, %v515_v58  ;;  %v537_v23 = vsel %vm493_vm0, %v2080_v11, 0.0  ;;  %v2460_v58 = vld [vmem:[#allocation2 + $0x28] sm:$0xff]   ;;  %v2463_v11 = vld [vmem:[#allocation2 + $0x40] sm:$0xff]  }
  0x4a   :  { %v498_v51 = vadd.f32 %v497_v44, %v496_v43  ;;  %v539_v25 = vsel %vm493_vm0, %v2083_v15, 0.0  ;;  %v2459_v44 = vld [vmem:[#allocation2 + $0x20] sm:$0xff]   ;;  %v2464_v15 = vld [vmem:[#allocation2 + $0x48] sm:$0xff]  }
  0x4b   :  { %v519_v9 = vadd.f32 %v518_v0, %v517_v63 }
  0x4c   :  { %2239 = vmatpush3.bf16.msra.mxu0 %v1979_v18  ;;  %v500_v61 = vadd.f32 %v499_v47, %v498_v51 }
  0x4d   :  { %2240 = vmatprep.subr.bf16.mxu0 %v1978_v22  ;;  %v521_v18 = vadd.f32 %v520_v3, %v519_v9 }
  0x4e   :  { %v502_v8 = vadd.f32 %v501_v52, %v500_v61 }
  0x4f   :  { %v523_v28 = vadd.f32 %v522_v13, %v521_v18 }
  0x50   :  { %2241 = vmatpush3.bf16.msra.mxu0 %v1978_v22  ;;  %v504_v17 = vadd.f32 %v503_v2, %v502_v8  ;;  %v536_v22 = vsel %vm493_vm0, %v2079_v10, 0.0  ;;  %v2462_v8 = vld [vmem:[#allocation2 + $0x38] sm:$0xff]  }
  0x51   :  { %2242 = vmatprep.subr.bf16.mxu0 %v1977_v37  ;;  %v538_v30 = vadd.f32 %v537_v23, %v536_v22  ;;  %v2467_v23 = vld [vmem:[#allocation2 + $0x60] sm:$0xff]  }
  0x52   :  { %v506_v27 = vadd.f32 %v505_v38, %v504_v17  ;;  %v543_v38 = vsel %vm493_vm0, %v2087_v20, 0.0  ;;  %v2466_v20 = vld [vmem:[#allocation2 + $0x58] sm:$0xff]  }
  0x53   :  { %v540_v39 = vadd.f32 %v539_v25, %v538_v30  ;;  %v2763_v30 = vld [vmem:[#allocation4 + $0x78] sm:$0xff]  }
  0x54   :  { %2243 = vmatpush3.bf16.msra.mxu0 %v1977_v37  ;;  %v508_v36 = vadd.f32 %v507_v45, %v506_v27  ;;  %v525_v37 = vadd.f32 %v524_v19, %v523_v28  ;;  %v2469_v28 = vld [vmem:[#allocation2 + $0x70] sm:$0xff]  }
  0x55   :  { %v542_v43 = vadd.f32 %v541_v33, %v540_v39  ;;  %v2108_v33 = vunpack.c.h.bf16 %v2763_v30 }
  0x56   :  { %v509_v41 = vrot.slane %v508_v36, 4  ;;  %v527_v42 = vadd.f32 %v526_v56, %v525_v37  ;;  %v2461_v56 = vld [vmem:[#allocation2 + $0x30] sm:$0xff]  }
  0x57   :  { %2245 = vmatmul.mubr.bf16.vlgmr.msra.gmra.mxu0 %v2456_v7  ;;  %v544_v50 = vadd.f32 %v543_v38, %v542_v43 }
  0x58   :  { %2248 = vmatprep.mubr.bf16.mxu0 %v2457_v12  ;;  %v510_v47 = vadd.f32 %v509_v41, %v508_v36  ;;  %v529_v49 = vadd.f32 %v528_v14, %v527_v42  ;;  %v2122_v36 = vld [vmem:[#allocation4 + $0x70] sm:$0xff]   ;;  %v570_v41 = vsel %vm493_vm0, %v2108_v33, 0.0 }
  0x59   :  { %v546_v45 = vadd.f32 %v545_v46, %v544_v50  ;;  %v2103_v42 = vunpack.c.l.bf16 %v2122_v36  ;;  %596 = vadd.xlane.f32.xlu1 %v570_v41 }
  0x5a   :  { %v511_v51 = vrot.slane %v510_v47, 2  ;;  %v530_v52 = vrot.slane %v529_v49, 4 }
  0x5b   :  { %v548_v57 = vadd.f32 %v547_v34, %v546_v45  ;;  %v2120_v34 = vld [vmem:[#allocation4 + $0x60] sm:$0xff]   ;;  %v2654_v45 = vmov 0.0  }
  0x5c   :  { %v512_v53 = vadd.f32 %v511_v51, %v510_v47  ;;  %v531_v54 = vadd.f32 %v530_v52, %v529_v49  ;;  %v2095_v37 = vunpack.c.l.bf16 %v2120_v34  ;;  %v2096_v39 = vunpack.c.h.bf16 %v2120_v34  ;;  %2276 = vmatprep.subr.bf16.mxu1 %v2654_v45  ;;  %2284 = vmatprep.mubr.msk.bf16.mxu1 %vm2655_vm1, %v2654_v45 }
  0x5d   :  { %v550_v61 = vadd.f32 %v549_v29, %v548_v57  ;;  %v2470_v29 = vld [vmem:[#allocation2 + $0x78] sm:$0xff]   ;;  %v2104_v49 = vunpack.c.h.bf16 %v2122_v36  ;;  %v564_v52 = vsel %vm493_vm0, %v2103_v42, 0.0 }
  0x5e   :  { %v513_v59 = vrot.slane %v512_v53, 1  ;;  %v532_v60 = vrot.slane %v531_v54, 2  ;;  %v557_v43 = vsel %vm493_vm0, %v2095_v37, 0.0 }
  0x5f   :  { %2249 = vmatmul.mubr.bf16.gmra.mxu0 %v2458_v40  ;;  %v551_v0 = vrot.slane %v550_v61, 4 }
  0x60   :  { %2252 = vmatprep.mubr.bf16.mxu0 %v2459_v44  ;;  %v514_v62 = vadd.f32 %v513_v59, %v512_v53  ;;  %v533_v63 = vadd.f32 %v532_v60, %v531_v54  ;;  %v558_v44 = vsel %vm493_vm0, %v2096_v39, 0.0  ;;  %v566_v54 = vsel %vm493_vm0, %v2104_v49, 0.0 }
  0x61   :  { %v552_v3 = vadd.f32 %v551_v0, %v550_v61  ;;  %v559_v47 = vadd.f32 %v558_v44, %v557_v43 }
  0x62   :  { %v578_v1 = vmax.f32 %v514_v62, 1e-06  ;;  %v534_v2 = vrot.slane %v533_v63, 1 }
  0x63   :  { %v553_v7 = vrot.slane %v552_v3, 2 }
  0x64   :  { %2471 = vrsqrt.f32 %v578_v1  ;;  %v535_v6 = vadd.f32 %v534_v2, %v533_v63 }
  0x65   :  { %v554_v10 = vadd.f32 %v553_v7, %v552_v3 }
  0x66   :  { %v579_v9 = vmax.f32 %v535_v6, 1e-06 }
  0x67   :  { %2253 = vmatmul.mubr.bf16.gmra.mxu0 %v2460_v58  ;;  %v555_v12 = vrot.slane %v554_v10, 1 }
  0x68   :  { %2256 = vmatprep.mubr.bf16.mxu0 %v2461_v56  ;;  %2473 = vrsqrt.f32 %v579_v9 }
  0x69   :  { %v556_v13 = vadd.f32 %v555_v12, %v554_v10 }
  0x6b   :  { %v580_v14 = vmax.f32 %v556_v13, 1e-06 }
  0x6d   :  { %2475 = vrsqrt.f32 %v580_v14 }
  0x6f   :  { %2257 = vmatmul.mubr.bf16.gmra.mxu0 %v2462_v8 }
  0x70   :  { %2260 = vmatprep.mubr.bf16.mxu0 %v2463_v11 }
  0x71   :  { %v2742_v17 = vpop.eup %2471 }
  0x72   :  { %v2747_v18 = vmul.f32 %v2742_v17, %v2060_v31  ;;  %v2468_v31 = vld [vmem:[#allocation2 + $0x68] sm:$0xff]  }
  0x75   :  { %v2749_v19 = vpop.eup %2473 }
  0x76   :  { %v2754_v22 = vmul.f32 %v2749_v19, %v2076_v4  ;;  %v2107_v4 = vunpack.c.l.bf16 %v2763_v30 }
  0x77   :  { %2261 = vmatmul.mubr.bf16.gmra.mxu0 %v2464_v15 }
  0x78   :  { %2264 = vmatprep.mubr.bf16.mxu0 %v2465_v16  ;;  %v568_v32 = vsel %vm493_vm0, %v2107_v4, 0.0 }
  0x79   :  { %594 = vadd.xlane.f32.xlu0 %v568_v32 }
  0x7a   :  { %v2756_v25 = vpop.eup %2475 }
  0x7b   :  { %v2761_v27 = vmul.f32 %v2756_v25, %v2091_v21  ;;  %v2121_v21 = vld [vmem:[#allocation4 + $0x68] sm:$0xff]   ;;  %v615_v37 = vmul.f32 %v2756_v25, %v2092_v5  ;;  %v2818_v25 = vld [vmem:[#allocation7] sm:$0xff] }
  0x7c   :  { %v2099_v38 = vunpack.c.l.bf16 %v2121_v21  ;;  %v2100_v40 = vunpack.c.h.bf16 %v2121_v21 }
  0x7e   :  { %v560_v46 = vsel %vm493_vm0, %v2099_v38, 0.0  ;;  %v562_v50 = vsel %vm493_vm0, %v2100_v40, 0.0  ;;  %v120_v40 = vlaneseq }
  0x7f   :  { %2265 = vmatmul.mubr.bf16.gmra.mxu0 %v2466_v20  ;;  %v561_v51 = vadd.f32 %v560_v46, %v559_v47 }
  0x80   :  { %2268 = vmatprep.mubr.bf16.mxu0 %v2467_v23 }
  0x81   :  { %v563_v53 = vadd.f32 %v562_v50, %v561_v51 }
  0x83   :  { %v565_v57 = vadd.f32 %v564_v52, %v563_v53 }
  0x85   :  { %v567_v58 = vadd.f32 %v566_v54, %v565_v57 }
  0x87   :  { %2269 = vmatmul.mubr.bf16.gmra.mxu0 %v2468_v31  ;;  %v569_v59 = vadd.f32 %v568_v32, %v567_v58  ;;  %v610_v31 = vmul.f32 %v2742_v17, %v2059_v26 }
  0x88   :  { %2272 = vmatprep.mubr.bf16.mxu0 %v2469_v28 }
  0x89   :  { %v571_v60 = vadd.f32 %v570_v41, %v569_v59 }
  0x8b   :  { %v572_v61 = vrot.slane %v571_v60, 4 }
  0x8d   :  { %v573_v56 = vadd.f32 %v572_v61, %v571_v60 }
  0x8f   :  { %2273 = vmatmul.mubr.bf16.gmra.mxu0 %v2470_v29  ;;  %v574_v62 = vrot.slane %v573_v56, 2 }
  0x91   :  { %v575_v63 = vadd.f32 %v574_v62, %v573_v56 }
  0x93   :  { %v576_v0 = vrot.slane %v575_v63, 1 }
  0x95   :  { %v577_v1 = vadd.f32 %v576_v0, %v575_v63 }
  0x97   :  { %v581_v2 = vmax.f32 %v577_v1, 1e-06 }
  0x99   :  { %2477 = vrsqrt.f32 %v581_v2 }
  0xa6   :  { %v2780_v3 = vpop.eup %2477 }
  0xa7   :  { %v2783_v6 = vmul.f32 %v2780_v3, %v2108_v33  ;;  %v612_v33 = vmul.f32 %v2749_v19, %v2075_v48 }
  0xc0   :  { %v583_v7 = vpop.xlane.xlu0 %582 }
  0xc1   :  { %v598_v8 = vmax.f32 %v583_v7, 1e-06 }
  0xc2   :  { %v587_v11 = vpop.xlane.xlu1 %586 }
  0xc3   :  { %2479 = vrsqrt.f32 %v598_v8  ;;  %v600_v12 = vmax.f32 %v587_v11, 1e-06 }
  0xc4   :  { %v585_v9 = vpop.xlane.xlu0 %584 }
  0xc5   :  { %v599_v10 = vmax.f32 %v585_v9, 1e-06 }
  0xc7   :  { %2481 = vrsqrt.f32 %v599_v10 }
  0xc8   :  { %2483 = vrsqrt.f32 %v600_v12  ;;  %v589_v13 = vpop.xlane.xlu1 %588 }
  0xc9   :  { %v601_v14 = vmax.f32 %v589_v13, 1e-06 }
  0xcb   :  { %2485 = vrsqrt.f32 %v601_v14 }
  0xcc   :  { %v593_v16 = vpop.xlane.xlu1 %592 }
  0xcd   :  { %v603_v23 = vmax.f32 %v593_v16, 1e-06 }
  0xd0   :  { %v591_v15 = vpop.xlane.xlu0 %590  ;;  %v2480_v28 = vpop.eup %2479 }
  0xd1   :  { %v602_v20 = vmax.f32 %v591_v15, 1e-06  ;;  %v2788_v29 = vmul.f32 %v2480_v28, %v610_v31 }
  0xd3   :  { %2487 = vrsqrt.f32 %v602_v20 }
  0xd4   :  { %2489 = vrsqrt.f32 %v603_v23  ;;  %v2482_v32 = vpop.eup %2481 }
  0xd5   :  { %v2484_v34 = vpop.eup %2483  ;;  %v2794_v21 = vmul.f32 %v2482_v32, %v2747_v18 }
  0xd6   :  { %v2798_v24 = vmul.f32 %v2484_v34, %v612_v33 }
  0xd7   :  { %v634_v36 = vpack.c.bf16 %v2794_v21, %v2788_v29  ;;  %v616_v29 = vmul.f32 %v2780_v3, %v2107_v4 }
  0xd8   :  { %v2486_v26 = vpop.eup %2485 }
  0xd9   :  { %v2801_v17 = vmul.f32 %v2486_v26, %v2754_v22  ;;  %v2815_v22 = vshrl.u32 %v120_v40, 7 }
  0xdb   :  { %v635_v48 = vpack.c.bf16 %v2801_v17, %v2798_v24  ;;  %v122_v5 = vsub.s32 0, %v2815_v22 }
  0xdd   :  { %v2821_v44 = vrot.slane %v2818_v25, %v122_v5 }
  0xe0   :  { %v2488_v35 = vpop.eup %2487 }
  0xe1   :  { %v2490_v19 = vpop.eup %2489  ;;  %v2809_v18 = vmul.f32 %v2488_v35, %v2761_v27 }
  0xe2   :  { %v2811_v39 = vmul.f32 %v2490_v19, %v615_v37  ;;  %v597_v0 = vpop.xlane.xlu1 %596 }
  0xe3   :  { %v605_v2 = vmax.f32 %v597_v0, 1e-06 }
  0xe4   :  { %v636_v38 = vpack.c.bf16 %v2811_v39, %v2809_v18 }
 0x102   :  { %v595_v58 = vpop.xlane.xlu0 %594 }
 0x103   :  { %v604_v60 = vmax.f32 %v595_v58, 1e-06 }
 0x105   :  { %2491 = vrsqrt.f32 %v604_v60 }
 0x106   :  { %2493 = vrsqrt.f32 %v605_v2 }
 0x112   :  { %v2492_v33 = vpop.eup %2491 }
 0x113   :  { %v2494_v21 = vpop.eup %2493  ;;  %v2874_v19 = vmul.f32 %v2492_v33, %v616_v29 }
 0x114   :  { %v2877_v40 = vmul.f32 %v2494_v21, %v2783_v6 }
 0x116   :  { %v637_v30 = vpack.c.bf16 %v2877_v40, %v2874_v19  ;;  %v1215_v40 = vld [vmem:[#allocation6 + $0x1cc] sm:$0xf] }
 0x117   :  { %v2246_v41 = vpop.f32.mrf.mxu0 }
 0x118   :  { %v311_v63 = vadd.f32 %v2246_v41, %v2821_v44 }
 0x119   :  { %v302_v55 = vpop.f32.mrf.mxu0 }
 0x11a   :  { %v303_v10 = vadd.f32 %v302_v55, %v2821_v44 }
 0x11b   :  { %v2247_v42 = vpop.f32.mrf.mxu0 }
 0x11c   :  { %v314_v61 = vadd.f32 %v2247_v42, %v2821_v44 }
 0x11d   :  { %v305_v43 = vpop.f32.mrf.mxu0 }
 0x11e   :  { %v639_v7 = vpack.c.bf16 %v314_v61, %v311_v63  ;;  %v306_v8 = vadd.f32 %v305_v43, %v2821_v44 }
 0x11f   :  { %v2250_v27 = vpop.f32.mrf.mxu0 }
 0x120   :  { %v2824_v46 = vadd.f32 %v2250_v27, %v2821_v44  ;;  %v638_v13 = vpack.c.bf16 %v306_v8, %v303_v10 }
 0x121   :  { %v318_v47 = vpop.f32.mrf.mxu0 }
 0x122   :  { %830 = vadd.xlane.f32.xlu0 %v2824_v46  ;;  %v319_v57 = vadd.f32 %v318_v47, %v2821_v44 }
 0x123   :  { %v2251_v49 = vpop.f32.mrf.mxu0 }
 0x124   :  { %v2828_v50 = vadd.f32 %v2251_v49, %v2821_v44 }
 0x125   :  { %v321_v51 = vpop.f32.mrf.mxu0 }
 0x126   :  { %v322_v52 = vadd.f32 %v321_v51, %v2821_v44  ;;  %832 = vadd.xlane.f32.xlu1 %v2828_v50  ;;  %v2834_v53 = vpack.c.bf16 %v2828_v50, %v2824_v46 }
 0x127   :  { %v2254_v54 = vpop.f32.mrf.mxu0 }
 0x128   :  { %2277 = vmatpush3.bf16.msra.mxu1 %v2834_v53  ;;  %v640_v56 = vpack.c.bf16 %v322_v52, %v319_v57 }
 0x129   :  { %v334_v59 = vpop.f32.mrf.mxu0  ;;  %2278 = vmatprep.subr.bf16.mxu1 %v2654_v45 }
 0x12a   :  { %v335_v4 = vadd.f32 %v334_v59, %v2821_v44 }
 0x12b   :  { %v2255_v62 = vpop.f32.mrf.mxu0 }
 0x12c   :  { %2279 = vmatpush3.bf16.msra.mxu1 %v640_v56  ;;  %v346_v34 = vadd.f32 %v2255_v62, %v2821_v44 }
 0x12d   :  { %v337_v1 = vpop.f32.mrf.mxu0  ;;  %2280 = vmatprep.subr.bf16.mxu1 %v2654_v45 }
 0x12e   :  { %v338_v55 = vadd.f32 %v337_v1, %v2821_v44 }
 0x12f   :  { %v2258_v9 = vpop.f32.mrf.mxu0 }
 0x130   :  { %v2845_v11 = vadd.f32 %v2258_v9, %v2821_v44  ;;  %2281 = vmatpush3.bf16.msra.mxu1 %v639_v7  ;;  %v642_v43 = vpack.c.bf16 %v338_v55, %v335_v4 }
 0x131   :  { %v350_v12 = vpop.f32.mrf.mxu0  ;;  %2282 = vmatprep.subr.bf16.mxu1 %v2654_v45 }
 0x132   :  { %834 = vadd.xlane.f32.xlu0 %v2845_v11  ;;  %v351_v28 = vadd.f32 %v350_v12, %v2821_v44 }
 0x133   :  { %v2259_v14 = vpop.f32.mrf.mxu0 }
 0x134   :  { %v2850_v15 = vadd.f32 %v2259_v14, %v2821_v44  ;;  %2283 = vmatpush3.bf16.msra.mxu1 %v638_v13 }
 0x135   :  { %v353_v16 = vpop.f32.mrf.mxu0  ;;  %2288 = vmatprep.subr.bf16.mxu1 %v2654_v45 }
 0x136   :  { %v2855_v20 = vpack.c.bf16 %v2850_v15, %v2845_v11  ;;  %v354_v23 = vadd.f32 %v353_v16, %v2821_v44  ;;  %836 = vadd.xlane.f32.xlu1 %v2850_v15 }
 0x137   :  { %v2262_v31 = vpop.f32.mrf.mxu0  ;;  %2285 = vmatmul.mubr.msk.bf16.vlgmr.msra.gmra.mxu1 %vm493_vm0, %v634_v36  ;;  %v343_v36 = vadd.f32 %v2254_v54, %v2821_v44 }
 0x138   :  { %2289 = vmatpush3.bf16.msra.mxu1 %v2855_v20  ;;  %2296 = vmatprep.mubr.msk.bf16.mxu1 %vm2655_vm1, %v2654_v45  ;;  %v644_v26 = vpack.c.bf16 %v354_v23, %v351_v28  ;;  %v375_v61 = vadd.f32 %v2262_v31, %v2821_v44 }
 0x139   :  { %v366_v32 = vpop.f32.mrf.mxu0  ;;  %2290 = vmatprep.subr.bf16.mxu1 %v2654_v45  ;;  %v643_v41 = vpack.c.bf16 %v346_v34, %v343_v36 }
 0x13a   :  { %v367_v62 = vadd.f32 %v366_v32, %v2821_v44 }
 0x13b   :  { %v2263_v37 = vpop.f32.mrf.mxu0 }
 0x13c   :  { %2291 = vmatpush3.bf16.msra.mxu1 %v644_v26  ;;  %v378_v58 = vadd.f32 %v2263_v37, %v2821_v44 }
 0x13d   :  { %v369_v35 = vpop.f32.mrf.mxu0  ;;  %2292 = vmatprep.subr.bf16.mxu1 %v2654_v45 }
 0x13e   :  { %v647_v17 = vpack.c.bf16 %v378_v58, %v375_v61 }
 0x13f   :  { %v2266_v5 = vpop.f32.mrf.mxu0 }
 0x140   :  { %v2884_v3 = vadd.f32 %v2266_v5, %v2821_v44  ;;  %2293 = vmatpush3.bf16.msra.mxu1 %v643_v41  ;;  %v1216_v41 = vld [vmem:[#allocation6 + $0x1ec] sm:$0xf]  ;;  %v1018_v5 = vld [vmem:[#allocation6 + $0x1c4] sm:$0xff] }
 0x141   :  { %v382_v42 = vpop.f32.mrf.mxu0  ;;  %2294 = vmatprep.subr.bf16.mxu1 %v2654_v45  ;;  %v2012_v55 = vcombine.low %v1215_v40, %v1216_v41  ;;  %v1203_v41 = vld [vmem:[#allocation6 + $0x4c] sm:$0xf] }
 0x142   :  { %838 = vadd.xlane.f32.xlu0 %v2884_v3  ;;  %v383_v54 = vadd.f32 %v382_v42, %v2821_v44  ;;  %v1213_v42 = vld [vmem:[#allocation6 + $0x18c] sm:$0xf] }
 0x143   :  { %v2267_v6 = vpop.f32.mrf.mxu0 }
 0x144   :  { %v2889_v27 = vadd.f32 %v2267_v6, %v2821_v44  ;;  %2295 = vmatpush3.bf16.msra.mxu1 %v642_v43  ;;  %v1214_v43 = vld [vmem:[#allocation6 + $0x1ac] sm:$0xf] }
 0x145   :  { %v385_v47 = vpop.f32.mrf.mxu0  ;;  %2300 = vmatprep.subr.bf16.mxu1 %v2654_v45 }
 0x146   :  { %v2894_v49 = vpack.c.bf16 %v2889_v27, %v2884_v3  ;;  %v386_v51 = vadd.f32 %v385_v47, %v2821_v44  ;;  %840 = vadd.xlane.f32.xlu1 %v2889_v27  ;;  %v1017_v47 = vld [vmem:[#allocation6 + $0x1a4] sm:$0xff] }
 0x147   :  { %v2270_v52 = vpop.f32.mrf.mxu0  ;;  %2297 = vmatmul.mubr.msk.bf16.vlgmr.msra.gmra.mxu1 %vm493_vm0, %v635_v48  ;;  %v370_v48 = vadd.f32 %v369_v35, %v2821_v44 }
 0x148   :  { %2301 = vmatpush3.bf16.msra.mxu1 %v2894_v49  ;;  %2308 = vmatprep.mubr.msk.bf16.mxu1 %vm2655_vm1, %v2654_v45  ;;  %v648_v59 = vpack.c.bf16 %v386_v51, %v383_v54  ;;  %v407_v16 = vadd.f32 %v2270_v52, %v2821_v44  ;;  %v2011_v51 = vcombine.low %v1213_v42, %v1214_v43  ;;  %v1006_v42 = vld [vmem:[#allocation6 + $0x44] sm:$0xff] }
 0x149   :  { %v398_v57 = vpop.f32.mrf.mxu0  ;;  %2302 = vmatprep.subr.bf16.mxu1 %v2654_v45  ;;  %v646_v1 = vpack.c.bf16 %v370_v48, %v367_v62  ;;  %v1015_v62 = vld [vmem:[#allocation6 + $0x164] sm:$0xff] }
 0x14a   :  { %v1007_v43 = vld [vmem:[#allocation6 + $0x64] sm:$0xff] }
 0x14b   :  { %v2271_v60 = vpop.f32.mrf.mxu0 }
 0x14c   :  { %2303 = vmatpush3.bf16.msra.mxu1 %v648_v59  ;;  %v410_v13 = vadd.f32 %v2271_v60, %v2821_v44  ;;  %v1211_v59 = vld [vmem:[#allocation6 + $0x14c] sm:$0xf] }
 0x14d   :  { %v401_v24 = vpop.f32.mrf.mxu0  ;;  %2304 = vmatprep.subr.bf16.mxu1 %v2654_v45  ;;  %v1212_v60 = vld [vmem:[#allocation6 + $0x16c] sm:$0xf] }
 0x14e   :  { %v651_v18 = vpack.c.bf16 %v410_v13, %v407_v16  ;;  %v402_v39 = vadd.f32 %v401_v24, %v2821_v44  ;;  %v2010_v24 = vcombine.low %v1211_v59, %v1212_v60  ;;  %v1012_v13 = vld [vmem:[#allocation6 + $0x104] sm:$0xff] }
 0x14f   :  { %v2274_v56 = vpop.f32.mrf.mxu0  ;;  %v1005_v59 = vld [vmem:[#allocation6 + $0x24] sm:$0xff] }
 0x150   :  { %v2913_v63 = vadd.f32 %v2274_v56, %v2821_v44  ;;  %2305 = vmatpush3.bf16.msra.mxu1 %v647_v17  ;;  %v1014_v56 = vld [vmem:[#allocation6 + $0x144] sm:$0xff] }
 0x151   :  { %v414_v0 = vpop.f32.mrf.mxu0  ;;  %2306 = vmatprep.subr.bf16.mxu1 %v2654_v45 }
 0x152   :  { %842 = vadd.xlane.f32.xlu0 %v2913_v63  ;;  %v415_v12 = vadd.f32 %v414_v0, %v2821_v44  ;;  %v2000_v0 = vcombine.high %v1014_v56, %v1015_v62 }
 0x153   :  { %v2275_v2 = vpop.f32.mrf.mxu0 }
 0x154   :  { %v2918_v7 = vadd.f32 %v2275_v2, %v2821_v44  ;;  %2307 = vmatpush3.bf16.msra.mxu1 %v646_v1  ;;  %v1209_v2 = vld [vmem:[#allocation6 + $0x10c] sm:$0xf] }
 0x155   :  { %v417_v8 = vpop.f32.mrf.mxu0  ;;  %2312 = vmatprep.subr.bf16.mxu1 %v2654_v45 }
 0x156   :  { %v2923_v9 = vpack.c.bf16 %v2918_v7, %v2913_v63  ;;  %v418_v10 = vadd.f32 %v417_v8, %v2821_v44  ;;  %844 = vadd.xlane.f32.xlu1 %v2918_v7  ;;  %v1210_v8 = vld [vmem:[#allocation6 + $0x12c] sm:$0xf] }
 0x157   :  { %2309 = vmatmul.mubr.msk.bf16.vlgmr.msra.gmra.mxu1 %vm493_vm0, %v636_v38  ;;  %v399_v38 = vadd.f32 %v398_v57, %v2821_v44 }
 0x158   :  { %2313 = vmatpush3.bf16.msra.mxu1 %v2923_v9  ;;  %2320 = vmatprep.mubr.msk.bf16.mxu1 %vm2655_vm1, %v2654_v45  ;;  %v652_v14 = vpack.c.bf16 %v418_v10, %v415_v12  ;;  %v2009_v10 = vcombine.low %v1209_v2, %v1210_v8 }
 0x159   :  { %2314 = vmatprep.subr.bf16.mxu1 %v2654_v45  ;;  %v650_v23 = vpack.c.bf16 %v402_v39, %v399_v38  ;;  %v1208_v39 = vld [vmem:[#allocation6 + $0xec] sm:$0xf] }
 0x15c   :  { %2315 = vmatpush3.bf16.msra.mxu1 %v652_v14  ;;  %v1013_v14 = vld [vmem:[#allocation6 + $0x124] sm:$0xff] }
 0x15d   :  { %2316 = vmatprep.subr.bf16.mxu1 %v2654_v45  ;;  %v1998_v16 = vcombine.high %v1012_v13, %v1013_v14 }
 0x160   :  { %2317 = vmatpush3.bf16.msra.mxu1 %v651_v18  ;;  %v1997_v18 = vcombine.low %v1012_v13, %v1013_v14 }
 0x161   :  { %2318 = vmatprep.subr.bf16.mxu1 %v2654_v45 }
 0x164   :  { %2319 = vmatpush3.bf16.msra.mxu1 %v650_v23  ;;  %v1010_v23 = vld [vmem:[#allocation6 + $0xc4] sm:$0xff] }
 0x165   :  { %2324 = vmatprep.subr.bf16.mxu1 %v2012_v55 }
 0x167   :  { %2321 = vmatmul.mubr.msk.bf16.vlgmr.msra.gmra.mxu1 %vm493_vm0, %v637_v30  ;;  %v1019_v30 = vld [vmem:[#allocation6 + $0x1e4] sm:$0xff] }
 0x168   :  { %v2003_v4 = vcombine.low %v1018_v5, %v1019_v30  ;;  %2325 = vmatpush3.bf16.msra.mxu1 %v2012_v55  ;;  %v1204_v55 = vld [vmem:[#allocation6 + $0x6c] sm:$0xf] }
 0x169   :  { %2326 = vmatprep.subr.bf16.mxu1 %v2011_v51 }
 0x16c   :  { %2327 = vmatpush3.bf16.msra.mxu1 %v2011_v51  ;;  %v1202_v51 = vld [vmem:[#allocation6 + $0x2c] sm:$0xf] }
 0x16d   :  { %2328 = vmatprep.subr.bf16.mxu1 %v2010_v24 }
 0x170   :  { %2329 = vmatpush3.bf16.msra.mxu1 %v2010_v24 }
 0x171   :  { %2330 = vmatprep.subr.bf16.mxu1 %v2009_v10 }
 0x174   :  { %2331 = vmatpush3.bf16.msra.mxu1 %v2009_v10 }
 0x1ab   :  { %v831_v31 = vpop.xlane.xlu0 %830 }
 0x1ac   :  { %v847_v28 = vmul.f32 0.0078125, %v831_v31  ;;  %v1011_v31 = vld [vmem:[#allocation6 + $0xe4] sm:$0xff] }
 0x1ae   :  { %v2947_v32 = vsub.f32 %v2824_v46, %v847_v28  ;;  %v1996_v28 = vcombine.high %v1010_v23, %v1011_v31 }
 0x1af   :  { %v833_v33 = vpop.xlane.xlu1 %832 }
 0x1b0   :  { %v848_v34 = vmul.f32 0.0078125, %v833_v33  ;;  %v863_v44 = vmul.f32 %v2947_v32, %v2947_v32  ;;  %v1995_v33 = vcombine.low %v1010_v23, %v1011_v31 }
 0x1b2   :  { %v2952_v26 = vsub.f32 %v2828_v50, %v848_v34  ;;  %871 = vadd.xlane.f32.xlu0 %v863_v44  ;;  %v1205_v34 = vld [vmem:[#allocation6 + $0x8c] sm:$0xf] }
 0x1b3   :  { %v1206_v44 = vld [vmem:[#allocation6 + $0xac] sm:$0xf] }
 0x1b4   :  { %v864_v45 = vmul.f32 %v2952_v26, %v2952_v26 }
 0x1b6   :  { %873 = vadd.xlane.f32.xlu1 %v864_v45 }
 0x1bb   :  { %v835_v37 = vpop.xlane.xlu0 %834 }
 0x1bc   :  { %v849_v29 = vmul.f32 0.0078125, %v835_v37  ;;  %v2007_v37 = vcombine.low %v1205_v34, %v1206_v44 }
 0x1be   :  { %v2957_v21 = vsub.f32 %v2845_v11, %v849_v29  ;;  %v2004_v11 = vcombine.high %v1018_v5, %v1019_v30  ;;  %v2006_v30 = vcombine.low %v1203_v41, %v1204_v55 }
 0x1bf   :  { %v837_v46 = vpop.xlane.xlu1 %836 }
 0x1c0   :  { %v850_v36 = vmul.f32 0.0078125, %v837_v46  ;;  %v865_v35 = vmul.f32 %v2957_v21, %v2957_v21  ;;  %1100 = vmatprep.subr.bf16.mxu0 %v2004_v11  ;;  %v1008_v46 = vld [vmem:[#allocation6 + $0x84] sm:$0xff] }
 0x1c1   :  { %1101 = vmatpush1.bf16.msra.mxu0 %v2003_v4 }
 0x1c2   :  { %v2962_v19 = vsub.f32 %v2850_v15, %v850_v36  ;;  %875 = vadd.xlane.f32.xlu0 %v865_v35  ;;  %v1016_v15 = vld [vmem:[#allocation6 + $0x184] sm:$0xff] }
 0x1c3   :  { %v2002_v54 = vcombine.high %v1016_v15, %v1017_v47  ;;  %v2001_v57 = vcombine.low %v1016_v15, %v1017_v47  ;;  %v1009_v36 = vld [vmem:[#allocation6 + $0xa4] sm:$0xff]  ;;  %v1201_v47 = vld [vmem:[#allocation6 + $0xc] sm:$0xf] }
 0x1c4   :  { %v866_v50 = vmul.f32 %v2962_v19, %v2962_v19  ;;  %v1994_v35 = vcombine.high %v1008_v46, %v1009_v36  ;;  %v1993_v40 = vcombine.low %v1008_v46, %v1009_v36 }
 0x1c5   :  { %1102 = vmatprep.subr.bf16.mxu0 %v2002_v54 }
 0x1c6   :  { %877 = vadd.xlane.f32.xlu1 %v866_v50  ;;  %1103 = vmatpush1.bf16.msra.mxu0 %v2001_v57  ;;  %v1004_v57 = vld [vmem:[#allocation6 + $0x4] sm:$0xff] }
 0x1c7   :  { %1104 = vmatprep.subr.bf16.mxu0 %v2000_v0  ;;  %v1990_v60 = vcombine.high %v1004_v57, %v1005_v59 }
 0x1cb   :  { %v839_v6 = vpop.xlane.xlu0 %838 }
 0x1cc   :  { %v851_v52 = vmul.f32 0.0078125, %v839_v6  ;;  %v1992_v6 = vcombine.high %v1006_v42, %v1007_v43 }
 0x1ce   :  { %v2967_v58 = vsub.f32 %v2884_v3, %v851_v52  ;;  %v1999_v3 = vcombine.low %v1014_v56, %v1015_v62  ;;  %v2005_v52 = vcombine.low %v1201_v47, %v1202_v51 }
 0x1cf   :  { %v841_v61 = vpop.xlane.xlu1 %840 }
 0x1d0   :  { %v852_v17 = vmul.f32 0.0078125, %v841_v61  ;;  %v867_v48 = vmul.f32 %v2967_v58, %v2967_v58  ;;  %1105 = vmatpush1.bf16.msra.mxu0 %v1999_v3  ;;  %v1989_v61 = vcombine.low %v1004_v57, %v1005_v59 }
 0x1d1   :  { %1106 = vmatprep.subr.bf16.mxu0 %v1998_v16  ;;  %v1368_v16 = vld [vmem:[#allocation6 + $0x1d8] sm:$0xf] }
 0x1d2   :  { %v2972_v1 = vsub.f32 %v2889_v27, %v852_v17  ;;  %879 = vadd.xlane.f32.xlu0 %v867_v48  ;;  %v1207_v27 = vld [vmem:[#allocation6 + $0xcc] sm:$0xf] }
 0x1d3   :  { %v2008_v38 = vcombine.low %v1207_v27, %v1208_v39 }
 0x1d4   :  { %v868_v12 = vmul.f32 %v2972_v1, %v2972_v1  ;;  %1107 = vmatpush1.bf16.msra.mxu0 %v1997_v18  ;;  %v1369_v18 = vld [vmem:[#allocation6 + $0x1f8] sm:$0xf] }
 0x1d5   :  { %2332 = vmatprep.subr.bf16.mxu1 %v2008_v38  ;;  %1108 = vmatprep.subr.bf16.mxu0 %v1996_v28  ;;  %v2987_v39 = vcombine.low %v1368_v16, %v1369_v18 }
 0x1d6   :  { %881 = vadd.xlane.f32.xlu1 %v868_v12  ;;  %2333 = vmatpush3.bf16.msra.mxu1 %v2008_v38 }
 0x1d7   :  { %2334 = vmatprep.subr.bf16.mxu1 %v2007_v37 }
 0x1d8   :  { %1109 = vmatpush1.bf16.msra.mxu0 %v1995_v33 }
 0x1d9   :  { %1110 = vmatprep.subr.bf16.mxu0 %v1994_v35 }
 0x1da   :  { %2335 = vmatpush3.bf16.msra.mxu1 %v2007_v37 }
 0x1db   :  { %v843_v45 = vpop.xlane.xlu0 %842  ;;  %2336 = vmatprep.subr.bf16.mxu1 %v2006_v30 }
 0x1dc   :  { %v853_v29 = vmul.f32 0.0078125, %v843_v45  ;;  %1111 = vmatpush1.bf16.msra.mxu0 %v1993_v40 }
 0x1dd   :  { %1112 = vmatprep.subr.bf16.mxu0 %v1992_v6 }
 0x1de   :  { %v2977_v50 = vsub.f32 %v2913_v63, %v853_v29  ;;  %2337 = vmatpush3.bf16.msra.mxu1 %v2006_v30  ;;  %v1991_v63 = vcombine.low %v1006_v42, %v1007_v43 }
 0x1df   :  { %v845_v5 = vpop.xlane.xlu1 %844  ;;  %2338 = vmatprep.subr.bf16.mxu1 %v2005_v52 }
 0x1e0   :  { %v854_v11 = vmul.f32 0.0078125, %v845_v5  ;;  %v869_v4 = vmul.f32 %v2977_v50, %v2977_v50  ;;  %1113 = vmatpush1.bf16.msra.mxu0 %v1991_v63 }
 0x1e1   :  { %1114 = vmatprep.subr.bf16.mxu0 %v1990_v60 }
 0x1e2   :  { %v2982_v15 = vsub.f32 %v2918_v7, %v854_v11  ;;  %883 = vadd.xlane.f32.xlu0 %v869_v4  ;;  %2339 = vmatpush3.bf16.msra.mxu1 %v2005_v52  ;;  %v2656_v7 = vmov 0   ;;  %v898_v52 = vsub.s32 1, %v2815_v22 }
 0x1e3   :  { %1132 = vmatprep.mubr.bf16.mxu0 %v2656_v7 }
 0x1e4   :  { %v870_v54 = vmul.f32 %v2982_v15, %v2982_v15  ;;  %1115 = vmatpush1.bf16.msra.mxu0 %v1989_v61  ;;  %v2992_v59 = vrot.slane %v2818_v25, %v898_v52 }
 0x1e5   :  { %2348 = vmatprep.subr.bf16.mxu0 %v2987_v39 }
 0x1e6   :  { %885 = vadd.xlane.f32.xlu1 %v870_v54 }
 0x1f7   :  { %v691_v24 = vpop.f32.mrf.mxu1 }
 0x1f9   :  { %v2286_v17 = vpop.f32.mrf.mxu1 }
 0x1fa   :  { %v990_v17 = vsub.s32 2, %v2815_v22 }
 0x1fb   :  { %v694_v48 = vpop.f32.mrf.mxu1 }
 0x1fc   :  { %v1197_v56 = vpack.c.bf16 %v694_v48, %v691_v24 }
 0x1fd   :  { %v2287_v62 = vpop.f32.mrf.mxu1 }
 0x1fe   :  { %2340 = vmatprep.mubr.bf16.mxu1 %v1197_v56 }
 0x207   :  { %v735_v0 = vpop.f32.mrf.mxu1 }
 0x209   :  { %v2298_v3 = vpop.f32.mrf.mxu1 }
 0x20b   :  { %v738_v2 = vpop.f32.mrf.mxu1 }
 0x20c   :  { %v1198_v8 = vpack.c.bf16 %v738_v2, %v735_v0  ;;  %v900_v2 = vmul.f32 %v2992_v59, %v2947_v32 }
 0x20d   :  { %v2299_v10 = vpop.f32.mrf.mxu1 }
 0x20e   :  { %2341 = vmatmul.mubr.bf16.vlgmr.msra.gmra.mxu1 %v1198_v8 }
 0x217   :  { %v779_v12 = vpop.f32.mrf.mxu1 }
 0x219   :  { %v2310_v13 = vpop.f32.mrf.mxu1 }
 0x21b   :  { %v782_v14 = vpop.f32.mrf.mxu1 }
 0x21c   :  { %v1199_v27 = vpack.c.bf16 %v782_v14, %v779_v12  ;;  %v901_v12 = vmul.f32 %v2992_v59, %v2952_v26  ;;  %v3000_v14 = vrot.slane %v2818_v25, %v990_v17 }
 0x21d   :  { %v2311_v38 = vpop.f32.mrf.mxu1 }
 0x21e   :  { %2344 = vmatprep.mubr.bf16.mxu1 %v1199_v27 }
 0x227   :  { %v823_v23 = vpop.f32.mrf.mxu1 }
 0x229   :  { %v2322_v31 = vpop.f32.mrf.mxu1 }
 0x22b   :  { %v826_v28 = vpop.f32.mrf.mxu1 }
 0x22c   :  { %v1200_v33 = vpack.c.bf16 %v826_v28, %v823_v23 }
 0x22d   :  { %v2323_v34 = vpop.f32.mrf.mxu1 }
 0x22e   :  { %2345 = vmatmul.mubr.bf16.gmra.mxu1 %v1200_v33 }
 0x23b   :  { %v872_v44 = vpop.xlane.xlu0 %871 }
 0x23c   :  { %v888_v45 = vmul.f32 0.007874016, %v872_v44 }
 0x23e   :  { %2495 = vrsqrt.f32 %v888_v45  ;;  %vm910_vm2 = vcmp.eq.f32.partialorder %v888_v45, inf  ;;  %v913_v41 = vand.u32 2147483648, %v888_v45  ;;  %vm912_vm3 = vcmp.eq.f32.partialorder %v888_v45, 0.0 }
 0x23f   :  { %v874_v37 = vpop.xlane.xlu1 %873 }
 0x240   :  { %v889_v29 = vmul.f32 0.007874016, %v874_v37 }
 0x242   :  { %2497 = vrsqrt.f32 %v889_v29  ;;  %vm917_vm4 = vcmp.eq.f32.partialorder %v889_v29, inf  ;;  %v920_v6 = vand.u32 2147483648, %v889_v29  ;;  %vm919_vm5 = vcmp.eq.f32.partialorder %v889_v29, 0.0 }
 0x24b   :  { %v2496_v46 = vpop.eup %2495  ;;  %v876_v36 = vpop.xlane.xlu0 %875 }
 0x24c   :  { %v909_v35 = vmul.f32 %v2496_v46, %v888_v45  ;;  %v890_v40 = vmul.f32 0.007874016, %v876_v36 }
 0x24e   :  { %v911_v55 = vsel %vm910_vm2, %v888_v45, %v909_v35  ;;  %2499 = vrsqrt.f32 %v890_v40  ;;  %vm924_vm6 = vcmp.eq.f32.partialorder %v890_v40, inf  ;;  %v927_v24 = vand.u32 2147483648, %v890_v40 }
 0x24f   :  { %v2498_v5 = vpop.eup %2497  ;;  %v914_v30 = vsel %vm912_vm3, %v913_v41, %v911_v55  ;;  %v878_v11 = vpop.xlane.xlu1 %877  ;;  %vm926_vm7 = vcmp.eq.f32.partialorder %v890_v40, 0.0 }
 0x250   :  { %v964_v4 = vadd.f32 1e-06, %v914_v30  ;;  %v916_v42 = vmul.f32 %v2498_v5, %v889_v29  ;;  %v891_v43 = vmul.f32 0.007874016, %v878_v11  ;;  %v902_v30 = vmul.f32 %v2992_v59, %v2957_v21 }
 0x252   :  { %2501 = vrcp.f32 %v964_v4  ;;  %v918_v63 = vsel %vm917_vm4, %v889_v29, %v916_v42  ;;  %vm931_vm8 = vcmp.eq.f32.partialorder %v891_v43, inf  ;;  %v934_v16 = vand.u32 2147483648, %v891_v43 }
 0x253   :  { %v921_v47 = vsel %vm919_vm5, %v920_v6, %v918_v63  ;;  %2503 = vrsqrt.f32 %v891_v43  ;;  %vm933_vm9 = vcmp.eq.f32.partialorder %v891_v43, 0.0 }
 0x254   :  { %v965_v51 = vadd.f32 1e-06, %v921_v47 }
 0x256   :  { %2505 = vrcp.f32 %v965_v51 }
 0x25b   :  { %v2500_v54 = vpop.eup %2499  ;;  %v880_v57 = vpop.xlane.xlu0 %879 }
 0x25c   :  { %v923_v60 = vmul.f32 %v2500_v54, %v890_v40  ;;  %v892_v61 = vmul.f32 0.007874016, %v880_v57 }
 0x25e   :  { %v925_v48 = vsel %vm924_vm6, %v890_v40, %v923_v60  ;;  %2507 = vrsqrt.f32 %v892_v61  ;;  %vm938_vm10 = vcmp.eq.f32.partialorder %v892_v61, inf  ;;  %v941_v29 = vand.u32 2147483648, %v892_v61 }
 0x25f   :  { %v2502_v56 = vpop.eup %2501  ;;  %v928_v62 = vsel %vm926_vm7, %v927_v24, %v925_v48  ;;  %v882_v0 = vpop.xlane.xlu1 %881  ;;  %vm940_vm11 = vcmp.eq.f32.partialorder %v892_v61, 0.0 }
 0x260   :  { %v2504_v3 = vpop.eup %2503  ;;  %v966_v8 = vadd.f32 1e-06, %v928_v62  ;;  %v893_v10 = vmul.f32 0.007874016, %v882_v0  ;;  %v973_v18 = vmul.f32 %v2502_v56, %v900_v2  ;;  %v904_v62 = vmul.f32 %v2992_v59, %v2967_v58 }
 0x261   :  { %v930_v13 = vmul.f32 %v2504_v3, %v891_v43  ;;  %v905_v3 = vmul.f32 %v2992_v59, %v2972_v1 }
 0x262   :  { %2509 = vrcp.f32 %v966_v8  ;;  %v992_v28 = vadd.f32 %v3000_v14, %v973_v18  ;;  %vm945_vm12 = vcmp.eq.f32.partialorder %v893_v10, inf  ;;  %v948_v4 = vand.u32 2147483648, %v893_v10 }
 0x263   :  { %v2506_v27 = vpop.eup %2505  ;;  %v932_v38 = vsel %vm931_vm8, %v891_v43, %v930_v13  ;;  %2511 = vrsqrt.f32 %v893_v10  ;;  %vm947_vm13 = vcmp.eq.f32.partialorder %v893_v10, 0.0 }
 0x264   :  { %v935_v23 = vsel %vm933_vm9, %v934_v16, %v932_v38  ;;  %v975_v31 = vmul.f32 %v2506_v27, %v901_v12 }
 0x265   :  { %v967_v32 = vadd.f32 1e-06, %v935_v23  ;;  %v906_v23 = vmul.f32 %v2992_v59, %v2977_v50 }
 0x266   :  { %v993_v33 = vadd.f32 %v3000_v14, %v975_v31  ;;  %v907_v31 = vmul.f32 %v2992_v59, %v2982_v15  ;;  %v1362_v15 = vld [vmem:[#allocation6 + $0x118] sm:$0xf] }
 0x267   :  { %2513 = vrcp.f32 %v967_v32 }
 0x268   :  { %v1000_v26 = vpack.c.bf16 %v993_v33, %v992_v28 }
 0x26a   :  { %1133 = vmatmul.mubr.bf16.vlgmr.msra.gmra.mxu0 %v1000_v26 }
 0x26b   :  { %v2508_v34 = vpop.eup %2507  ;;  %v884_v44 = vpop.xlane.xlu0 %883  ;;  %1142 = vmatprep.mubr.bf16.mxu0 %v2656_v7  ;;  %2349 = vmatpush3.bf16.msra.mxu0 %v2987_v39  ;;  %v903_v39 = vmul.f32 %v2992_v59, %v2962_v19  ;;  %v1363_v59 = vld [vmem:[#allocation6 + $0x138] sm:$0xf] }
 0x26c   :  { %v937_v45 = vmul.f32 %v2508_v34, %v892_v61  ;;  %v894_v37 = vmul.f32 0.007874016, %v884_v44 }
 0x26e   :  { %v939_v46 = vsel %vm938_vm10, %v892_v61, %v937_v45  ;;  %2515 = vrsqrt.f32 %v894_v37  ;;  %vm952_vm14 = vcmp.eq.f32.partialorder %v894_v37, inf  ;;  %v955_v60 = vand.u32 2147483648, %v894_v37  ;;  %v1366_v45 = vld [vmem:[#allocation6 + $0x198] sm:$0xf] }
 0x26f   :  { %v2510_v36 = vpop.eup %2509  ;;  %v942_v35 = vsel %vm940_vm11, %v941_v29, %v939_v46  ;;  %v886_v40 = vpop.xlane.xlu1 %885  ;;  %vm954_vm15 = vcmp.eq.f32.partialorder %v894_v37, 0.0  ;;  %v1365_v46 = vld [vmem:[#allocation6 + $0x178] sm:$0xf] }
 0x270   :  { %v2512_v41 = vpop.eup %2511  ;;  %v968_v55 = vadd.f32 1e-06, %v942_v35  ;;  %v895_v5 = vmul.f32 0.007874016, %v886_v40  ;;  %v977_v43 = vmul.f32 %v2510_v36, %v902_v30  ;;  %v2017_v36 = vcombine.low %v1362_v15, %v1363_v59  ;;  %v1360_v35 = vld [vmem:[#allocation6 + $0xd8] sm:$0xf] }
 0x271   :  { %v944_v11 = vmul.f32 %v2512_v41, %v893_v10  ;;  %v1361_v40 = vld [vmem:[#allocation6 + $0xf8] sm:$0xf] }
 0x272   :  { %2517 = vrcp.f32 %v968_v55  ;;  %v994_v52 = vadd.f32 %v3000_v14, %v977_v43  ;;  %vm959_vm0 = vcmp.eq.f32.partialorder %v895_v5, inf  ;;  %v962_v2 = vand.u32 2147483648, %v895_v5  ;;  %v1359_v55 = vld [vmem:[#allocation6 + $0xb8] sm:$0xf] }
 0x273   :  { %v946_v42 = vsel %vm945_vm12, %v893_v10, %v944_v11  ;;  %2519 = vrsqrt.f32 %v895_v5  ;;  %vm961_vm1 = vcmp.eq.f32.partialorder %v895_v5, 0.0  ;;  %v2016_v41 = vcombine.low %v1360_v35, %v1361_v40  ;;  %v1356_v30 = vld [vmem:[#allocation6 + $0x58] sm:$0xf] }
 0x274   :  { %v2514_v6 = vpop.eup %2513  ;;  %v949_v63 = vsel %vm947_vm13, %v948_v4, %v946_v42  ;;  %v1357_v11 = vld [vmem:[#allocation6 + $0x78] sm:$0xf] }
 0x275   :  { %v969_v47 = vadd.f32 1e-06, %v949_v63  ;;  %v979_v51 = vmul.f32 %v2514_v6, %v903_v39  ;;  %v2014_v39 = vcombine.low %v1356_v30, %v1357_v11  ;;  %v1354_v4 = vld [vmem:[#allocation6 + $0x18] sm:$0xf] }
 0x276   :  { %v1355_v42 = vld [vmem:[#allocation6 + $0x38] sm:$0xf] }
 0x277   :  { %2521 = vrcp.f32 %v969_v47  ;;  %v995_v21 = vadd.f32 %v3000_v14, %v979_v51  ;;  %v2013_v43 = vcombine.low %v1354_v4, %v1355_v42  ;;  %v1219_v47 = vsub.s32 5, %v2815_v22 }
 0x278   :  { %v1175_v51 = vsub.s32 3, %v2815_v22 }
 0x279   :  { %v1001_v54 = vpack.c.bf16 %v995_v21, %v994_v52  ;;  %v1220_v21 = vrot.slane %v2818_v25, %v1219_v47 }
 0x27b   :  { %v2516_v57 = vpop.eup %2515  ;;  %1143 = vmatmul.mubr.bf16.gmra.mxu0 %v1001_v54  ;;  %v3030_v54 = vrot.slane %v2818_v25, %v1175_v51 }
 0x27c   :  { %v951_v19 = vmul.f32 %v2516_v57, %v894_v37  ;;  %1152 = vmatprep.mubr.bf16.mxu0 %v2656_v7  ;;  %v1187_v57 = vsub.s32 4, %v2815_v22 }
 0x27e   :  { %v953_v61 = vsel %vm952_vm14, %v894_v37, %v951_v19  ;;  %v1367_v37 = vld [vmem:[#allocation6 + $0x1b8] sm:$0xf] }
 0x27f   :  { %v2518_v24 = vpop.eup %2517  ;;  %v956_v17 = vsel %vm954_vm15, %v955_v60, %v953_v61  ;;  %v2019_v29 = vcombine.low %v1366_v45, %v1367_v37 }
 0x280   :  { %v2520_v48 = vpop.eup %2519  ;;  %v970_v56 = vadd.f32 1e-06, %v956_v17  ;;  %v981_v10 = vmul.f32 %v2518_v24, %v904_v62  ;;  %v1188_v17 = vrot.slane %v2818_v25, %v1187_v57 }
 0x281   :  { %v958_v0 = vmul.f32 %v2520_v48, %v895_v5  ;;  %2350 = vmatprep.subr.bf16.mxu0 %v2019_v29 }
 0x282   :  { %2523 = vrcp.f32 %v970_v56  ;;  %v996_v27 = vadd.f32 %v3000_v14, %v981_v10  ;;  %2351 = vmatpush3.bf16.msra.mxu0 %v2019_v29 }
 0x283   :  { %v960_v8 = vsel %vm959_vm0, %v895_v5, %v958_v0 }
 0x284   :  { %v2522_v12 = vpop.eup %2521  ;;  %v963_v13 = vsel %vm961_vm1, %v962_v2, %v960_v8 }
 0x285   :  { %v971_v16 = vadd.f32 1e-06, %v963_v13  ;;  %v983_v18 = vmul.f32 %v2522_v12, %v905_v3 }
 0x287   :  { %2525 = vrcp.f32 %v971_v16  ;;  %v997_v38 = vadd.f32 %v3000_v14, %v983_v18 }
 0x289   :  { %v1002_v58 = vpack.c.bf16 %v997_v38, %v996_v27 }
 0x28b   :  { %1153 = vmatmul.mubr.bf16.gmra.mxu0 %v1002_v58 }
 0x28c   :  { %1162 = vmatprep.mubr.bf16.mxu0 %v2656_v7  ;;  %v1364_v7 = vld [vmem:[#allocation6 + $0x158] sm:$0xf] }
 0x28d   :  { %v2018_v50 = vcombine.low %v1364_v7, %v1365_v46 }
 0x28f   :  { %v2524_v1 = vpop.eup %2523  ;;  %2352 = vmatprep.subr.bf16.mxu0 %v2018_v50 }
 0x290   :  { %v985_v32 = vmul.f32 %v2524_v1, %v906_v23  ;;  %2353 = vmatpush3.bf16.msra.mxu0 %v2018_v50 }
 0x291   :  { %2354 = vmatprep.subr.bf16.mxu0 %v2017_v36 }
 0x292   :  { %v998_v26 = vadd.f32 %v3000_v14, %v985_v32 }
 0x294   :  { %v2526_v28 = vpop.eup %2525  ;;  %2355 = vmatpush3.bf16.msra.mxu0 %v2017_v36 }
 0x295   :  { %v987_v33 = vmul.f32 %v2526_v28, %v907_v31  ;;  %2356 = vmatprep.subr.bf16.mxu0 %v2016_v41 }
 0x297   :  { %v999_v34 = vadd.f32 %v3000_v14, %v987_v33  ;;  %v1358_v14 = vld [vmem:[#allocation6 + $0x98] sm:$0xf] }
 0x298   :  { %2357 = vmatpush3.bf16.msra.mxu0 %v2016_v41  ;;  %v2015_v5 = vcombine.low %v1358_v14, %v1359_v55 }
 0x299   :  { %v1003_v44 = vpack.c.bf16 %v999_v34, %v998_v26 }
 0x29a   :  { %2358 = vmatprep.subr.bf16.mxu0 %v2015_v5 }
 0x29b   :  { %1163 = vmatmul.mubr.bf16.gmra.mxu0 %v1003_v44 }
 0x29c   :  { %2359 = vmatpush3.bf16.msra.mxu0 %v2015_v5 }
 0x29d   :  { %2360 = vmatprep.subr.bf16.mxu0 %v2014_v39 }
 0x2a0   :  { %2361 = vmatpush3.bf16.msra.mxu0 %v2014_v39 }
 0x2a1   :  { %2362 = vmatprep.subr.bf16.mxu0 %v2013_v43 }
 0x2a4   :  { %2363 = vmatpush3.bf16.msra.mxu0 %v2013_v43 }
 0x2ce   :  { %v2342_v6 = vpop.f32.mrf.mxu1 }
 0x2cf   :  { %v3049_v58 = vadd.f32 %v2342_v6, %v1220_v21 }
 0x2d0   :  { %v1303_v63 = vpop.f32.mrf.mxu1 }
 0x2d1   :  { %v3034_v24 = vadd.f32 %v1303_v63, %v1220_v21 }
 0x2d2   :  { %v2343_v52 = vpop.f32.mrf.mxu1 }
 0x2d3   :  { %v3051_v31 = vadd.f32 %v2343_v52, %v1220_v21 }
 0x2d4   :  { %v1306_v60 = vpop.f32.mrf.mxu1 }
 0x2d5   :  { %v3037_v56 = vadd.f32 %v1306_v60, %v1220_v21 }
 0x2ee   :  { %v2346_v23 = vpop.f32.mrf.mxu1 }
 0x2ef   :  { %v3077_v51 = vadd.f32 %v2346_v23, %v1220_v21  ;;  %v1536_v23 = vld [vmem:[#allocation6 + $0x13c] sm:$0xf] }
 0x2f0   :  { %v1319_v45 = vpop.f32.mrf.mxu1 }
 0x2f1   :  { %v3063_v36 = vadd.f32 %v1319_v45, %v1220_v21  ;;  %v1531_v45 = vld [vmem:[#allocation6 + $0x9c] sm:$0xf] }
 0x2f2   :  { %v2347_v46 = vpop.f32.mrf.mxu1 }
 0x2f3   :  { %v3079_v57 = vadd.f32 %v2347_v46, %v1220_v21  ;;  %v1530_v46 = vld [vmem:[#allocation6 + $0x7c] sm:$0xf] }
 0x2f4   :  { %v1322_v15 = vpop.f32.mrf.mxu1 }
 0x2f5   :  { %v3065_v40 = vadd.f32 %v1322_v15, %v1220_v21  ;;  %v1542_v21 = vld [vmem:[#allocation6 + $0x1fc] sm:$0xf] }
 0x2f6   :  { %v1527_v15 = vld [vmem:[#allocation6 + $0x1c] sm:$0xf] }
 0x32a   :  { %v1134_v19 = vpop.f32.mrf.mxu0 }
 0x32b   :  { %v1177_v61 = vadd.f32 %v3030_v54, %v1134_v19 }
 0x32c   :  { %v1136_v48 = vpop.f32.mrf.mxu0 }
 0x32d   :  { %v3040_v0 = vsub.f32 %v1177_v61, %v3034_v24  ;;  %v1189_v3 = vadd.f32 %v1188_v17, %v1136_v48 }
 0x32e   :  { %v1138_v62 = vpop.f32.mrf.mxu0 }
 0x32f   :  { %v1178_v2 = vadd.f32 %v3030_v54, %v1138_v62  ;;  %v1342_v13 = vmul.f32 %v3040_v0, %v1189_v3 }
 0x330   :  { %v1140_v8 = vpop.f32.mrf.mxu0 }
 0x331   :  { %v3044_v10 = vsub.f32 %v1178_v2, %v3037_v56  ;;  %v1190_v12 = vadd.f32 %v1188_v17, %v1140_v8 }
 0x333   :  { %v1343_v16 = vmul.f32 %v3044_v10, %v1190_v12 }
 0x335   :  { %v1350_v25 = vpack.c.bf16 %v1343_v16, %v1342_v13  ;;  %v1541_v13 = vld [vmem:[#allocation6 + $0x1dc] sm:$0xf] }
 0x336   :  { %v2028_v16 = vcombine.low %v1541_v13, %v1542_v21 }
 0x337   :  { %2364 = vmatprep.mubr.bf16.mxu0 %v1350_v25  ;;  %v1539_v25 = vld [vmem:[#allocation6 + $0x19c] sm:$0xf] }
 0x338   :  { %2372 = vmatprep.subr.bf16.mxu1 %v2028_v16 }
 0x339   :  { %2373 = vmatpush3.bf16.msra.mxu1 %v2028_v16 }
 0x33b   :  { %v1144_v18 = vpop.f32.mrf.mxu0 }
 0x33c   :  { %v1179_v27 = vadd.f32 %v3030_v54, %v1144_v18  ;;  %v1540_v18 = vld [vmem:[#allocation6 + $0x1bc] sm:$0xf] }
 0x33d   :  { %v1146_v38 = vpop.f32.mrf.mxu0 }
 0x33e   :  { %v3054_v32 = vsub.f32 %v1179_v27, %v3049_v58  ;;  %v1191_v28 = vadd.f32 %v1188_v17, %v1146_v38  ;;  %v2027_v27 = vcombine.low %v1539_v25, %v1540_v18  ;;  %v1538_v38 = vld [vmem:[#allocation6 + $0x17c] sm:$0xf] }
 0x33f   :  { %v1148_v1 = vpop.f32.mrf.mxu0 }
 0x340   :  { %v1180_v33 = vadd.f32 %v3030_v54, %v1148_v1  ;;  %v1344_v37 = vmul.f32 %v3054_v32, %v1191_v28  ;;  %2374 = vmatprep.subr.bf16.mxu1 %v2027_v27 }
 0x341   :  { %v1150_v26 = vpop.f32.mrf.mxu0  ;;  %2375 = vmatpush3.bf16.msra.mxu1 %v2027_v27 }
 0x342   :  { %v3058_v34 = vsub.f32 %v1180_v33, %v3051_v31  ;;  %v1192_v44 = vadd.f32 %v1188_v17, %v1150_v26  ;;  %v1533_v33 = vld [vmem:[#allocation6 + $0xdc] sm:$0xf] }
 0x343   :  { %v1534_v26 = vld [vmem:[#allocation6 + $0xfc] sm:$0xf] }
 0x344   :  { %v1345_v29 = vmul.f32 %v3058_v34, %v1192_v44  ;;  %v2024_v44 = vcombine.low %v1533_v33, %v1534_v26 }
 0x346   :  { %v1351_v7 = vpack.c.bf16 %v1345_v29, %v1344_v37  ;;  %v1532_v37 = vld [vmem:[#allocation6 + $0xbc] sm:$0xf] }
 0x347   :  { %v2023_v29 = vcombine.low %v1531_v45, %v1532_v37 }
 0x348   :  { %2365 = vmatmul.mubr.bf16.vlgmr.msra.gmra.mxu0 %v1351_v7  ;;  %v1529_v7 = vld [vmem:[#allocation6 + $0x5c] sm:$0xf] }
 0x34b   :  { %v1154_v50 = vpop.f32.mrf.mxu0 }
 0x34c   :  { %v1181_v59 = vadd.f32 %v3030_v54, %v1154_v50  ;;  %v2022_v50 = vcombine.low %v1529_v7, %v1530_v46 }
 0x34d   :  { %v1156_v35 = vpop.f32.mrf.mxu0 }
 0x34e   :  { %v3068_v14 = vsub.f32 %v1181_v59, %v3063_v36  ;;  %v1193_v55 = vadd.f32 %v1188_v17, %v1156_v35  ;;  %v1528_v59 = vld [vmem:[#allocation6 + $0x3c] sm:$0xf] }
 0x34f   :  { %v1158_v41 = vpop.f32.mrf.mxu0  ;;  %v2021_v35 = vcombine.low %v1527_v15, %v1528_v59 }
 0x350   :  { %v1182_v5 = vadd.f32 %v3030_v54, %v1158_v41  ;;  %v1346_v4 = vmul.f32 %v3068_v14, %v1193_v55  ;;  %v1686_v41 = vld [vmem:[#allocation6 + $0x1d4] sm:$0xf] }
 0x351   :  { %v1160_v30 = vpop.f32.mrf.mxu0  ;;  %v1687_v55 = vld [vmem:[#allocation6 + $0x1f4] sm:$0xf] }
 0x352   :  { %v3072_v11 = vsub.f32 %v1182_v5, %v3065_v40  ;;  %v1194_v39 = vadd.f32 %v1188_v17, %v1160_v30  ;;  %v3090_v5 = vcombine.low %v1686_v41, %v1687_v55  ;;  %v1706_v30 = vld [vmem:[#allocation6 + $0x1d0] sm:$0xf] }
 0x354   :  { %v1347_v42 = vmul.f32 %v3072_v11, %v1194_v39  ;;  %v1707_v39 = vld [vmem:[#allocation6 + $0x1f0] sm:$0xf] }
 0x356   :  { %v1352_v43 = vpack.c.bf16 %v1347_v42, %v1346_v4  ;;  %v1704_v4 = vld [vmem:[#allocation6 + $0x190] sm:$0xf]  ;;  %v2036_v42 = vcombine.low %v1706_v30, %v1707_v39 }
 0x358   :  { %2368 = vmatprep.mubr.bf16.mxu0 %v1352_v43  ;;  %v1705_v43 = vld [vmem:[#allocation6 + $0x1b0] sm:$0xf]  ;;  %2396 = vmatprep.subr.bf16.mxu0 %v2036_v42 }
 0x359   :  { %2397 = vmatpush3.bf16.msra.mxu0 %v2036_v42  ;;  %v1684_v42 = vld [vmem:[#allocation6 + $0x194] sm:$0xf] }
 0x35b   :  { %v1164_v6 = vpop.f32.mrf.mxu0 }
 0x35c   :  { %v1183_v63 = vadd.f32 %v3030_v54, %v1164_v6  ;;  %v2035_v6 = vcombine.low %v1704_v4, %v1705_v43 }
 0x35d   :  { %v1166_v47 = vpop.f32.mrf.mxu0 }
 0x35e   :  { %v3082_v19 = vsub.f32 %v1183_v63, %v3077_v51  ;;  %v1195_v60 = vadd.f32 %v1188_v17, %v1166_v47  ;;  %v1702_v63 = vld [vmem:[#allocation6 + $0x150] sm:$0xf]  ;;  %2398 = vmatprep.subr.bf16.mxu0 %v2035_v6 }
 0x35f   :  { %v1168_v52 = vpop.f32.mrf.mxu0  ;;  %v1703_v47 = vld [vmem:[#allocation6 + $0x170] sm:$0xf]  ;;  %2399 = vmatpush3.bf16.msra.mxu0 %v2035_v6 }
 0x360   :  { %v1184_v61 = vadd.f32 %v3030_v54, %v1168_v52  ;;  %v1348_v2 = vmul.f32 %v3082_v19, %v1195_v60  ;;  %v1537_v54 = vld [vmem:[#allocation6 + $0x15c] sm:$0xf]  ;;  %v2034_v52 = vcombine.low %v1702_v63, %v1703_v47  ;;  %v1700_v60 = vld [vmem:[#allocation6 + $0x110] sm:$0xf]  ;;  %v1685_v47 = vld [vmem:[#allocation6 + $0x1b4] sm:$0xf] }
 0x361   :  { %v1170_v48 = vpop.f32.mrf.mxu0  ;;  %v2026_v1 = vcombine.low %v1537_v54, %v1538_v38 }
 0x362   :  { %v3086_v62 = vsub.f32 %v1184_v61, %v3079_v57  ;;  %v1196_v3 = vadd.f32 %v1188_v17, %v1170_v48  ;;  %v1535_v17 = vld [vmem:[#allocation6 + $0x11c] sm:$0xf]  ;;  %v1701_v61 = vld [vmem:[#allocation6 + $0x130] sm:$0xf]  ;;  %2400 = vmatprep.subr.bf16.mxu0 %v2034_v52 }
 0x363   :  { %2376 = vmatprep.subr.bf16.mxu1 %v2026_v1  ;;  %v2025_v28 = vcombine.low %v1535_v17, %v1536_v23  ;;  %v2033_v48 = vcombine.low %v1700_v60, %v1701_v61  ;;  %2401 = vmatpush3.bf16.msra.mxu0 %v2034_v52 }
 0x364   :  { %v1349_v8 = vmul.f32 %v3086_v62, %v1196_v3  ;;  %2377 = vmatpush3.bf16.msra.mxu1 %v2026_v1  ;;  %v1698_v3 = vld [vmem:[#allocation6 + $0xd0] sm:$0xf] }
 0x365   :  { %2378 = vmatprep.subr.bf16.mxu1 %v2025_v28  ;;  %2402 = vmatprep.subr.bf16.mxu0 %v2033_v48 }
 0x366   :  { %v1353_v12 = vpack.c.bf16 %v1349_v8, %v1348_v2  ;;  %v1699_v2 = vld [vmem:[#allocation6 + $0xf0] sm:$0xf] }
 0x367   :  { %v2032_v8 = vcombine.low %v1698_v3, %v1699_v2  ;;  %2403 = vmatpush3.bf16.msra.mxu0 %v2033_v48  ;;  %v2043_v2 = vcombine.low %v1684_v42, %v1685_v47  ;;  %v1696_v42 = vld [vmem:[#allocation6 + $0x90] sm:$0xf] }
 0x368   :  { %2369 = vmatmul.mubr.bf16.gmra.mxu0 %v1353_v12  ;;  %2379 = vmatpush3.bf16.msra.mxu1 %v2025_v28  ;;  %v1695_v47 = vld [vmem:[#allocation6 + $0x70] sm:$0xf] }
 0x369   :  { %2380 = vmatprep.subr.bf16.mxu1 %v2024_v44  ;;  %2404 = vmatprep.subr.bf16.mxu0 %v2032_v8 }
 0x36b   :  { %2405 = vmatpush3.bf16.msra.mxu0 %v2032_v8  ;;  %v1682_v8 = vld [vmem:[#allocation6 + $0x154] sm:$0xf] }
 0x36c   :  { %2381 = vmatpush3.bf16.msra.mxu1 %v2024_v44 }
 0x36d   :  { %2382 = vmatprep.subr.bf16.mxu1 %v2023_v29 }
 0x370   :  { %2383 = vmatpush3.bf16.msra.mxu1 %v2023_v29 }
 0x371   :  { %2384 = vmatprep.subr.bf16.mxu1 %v2022_v50 }
 0x374   :  { %2385 = vmatpush3.bf16.msra.mxu1 %v2022_v50 }
 0x375   :  { %2386 = vmatprep.subr.bf16.mxu1 %v2021_v35 }
 0x378   :  { %2387 = vmatpush3.bf16.msra.mxu1 %v2021_v35 }
 0x379   :  { %2420 = vmatprep.subr.bf16.mxu1 %v3090_v5 }
 0x408   :  { %v2366_v12 = vpop.f32.mrf.mxu0 }
 0x409   :  { %v1485_v13 = vsub.f32 0.0, %v2366_v12  ;;  %v1683_v12 = vld [vmem:[#allocation6 + $0x174] sm:$0xf] }
 0x40a   :  { %v1452_v21 = vpop.f32.mrf.mxu0 }
 0x40b   :  { %v1483_v16 = vsub.f32 0.0, %v1452_v21  ;;  %v1495_v25 = vmul.f32 1.442695, %v1485_v13  ;;  %v2042_v13 = vcombine.low %v1682_v8, %v1683_v12  ;;  %v1680_v21 = vld [vmem:[#allocation6 + $0x114] sm:$0xf] }
 0x40c   :  { %v2367_v18 = vpop.f32.mrf.mxu0 }
 0x40d   :  { %v1491_v27 = vmul.f32 1.442695, %v1483_v16  ;;  %v1486_v54 = vsub.f32 0.0, %v2367_v18  ;;  %v1681_v16 = vld [vmem:[#allocation6 + $0x134] sm:$0xf] }
 0x40e   :  { %v1455_v38 = vpop.f32.mrf.mxu0  ;;  %v1678_v18 = vld [vmem:[#allocation6 + $0xd4] sm:$0xf] }
 0x40f   :  { %2527 = vpow2.f32 %v1491_v27  ;;  %v1497_v1 = vmul.f32 1.442695, %v1486_v54  ;;  %v1484_v17 = vsub.f32 0.0, %v1455_v38  ;;  %v1679_v27 = vld [vmem:[#allocation6 + $0xf4] sm:$0xf] }
 0x410   :  { %2529 = vpow2.f32 %v1495_v25  ;;  %v2041_v25 = vcombine.low %v1680_v21, %v1681_v16 }
 0x411   :  { %2531 = vpow2.f32 %v1497_v1  ;;  %v1493_v23 = vmul.f32 1.442695, %v1484_v17 }
 0x413   :  { %2533 = vpow2.f32 %v1493_v23  ;;  %v2040_v23 = vcombine.low %v1678_v18, %v1679_v27 }
 0x41c   :  { %v2528_v28 = vpop.eup %2527 }
 0x41d   :  { %v2530_v33 = vpop.eup %2529  ;;  %v1507_v26 = vadd.f32 1.0, %v2528_v28 }
 0x41e   :  { %v2532_v44 = vpop.eup %2531  ;;  %v1509_v29 = vadd.f32 1.0, %v2530_v33  ;;  %v1676_v33 = vld [vmem:[#allocation6 + $0x94] sm:$0xf] }
 0x41f   :  { %v1510_v45 = vadd.f32 1.0, %v2532_v44  ;;  %2535 = vrcp.f32 %v1507_v26  ;;  %v1677_v26 = vld [vmem:[#allocation6 + $0xb4] sm:$0xf] }
 0x420   :  { %v2534_v37 = vpop.eup %2533 }
 0x421   :  { %v1508_v7 = vadd.f32 1.0, %v2534_v37  ;;  %2537 = vrcp.f32 %v1510_v45  ;;  %v2039_v37 = vcombine.low %v1676_v33, %v1677_v26 }
 0x423   :  { %2539 = vrcp.f32 %v1508_v7  ;;  %v1675_v7 = vld [vmem:[#allocation6 + $0x74] sm:$0xf] }
 0x424   :  { %2541 = vrcp.f32 %v1509_v29  ;;  %v1674_v29 = vld [vmem:[#allocation6 + $0x54] sm:$0xf] }
 0x428   :  { %v2370_v46 = vpop.f32.mrf.mxu0 }
 0x429   :  { %v1489_v50 = vsub.f32 0.0, %v2370_v46  ;;  %v2038_v46 = vcombine.low %v1674_v29, %v1675_v7 }
 0x42a   :  { %v1468_v15 = vpop.f32.mrf.mxu0 }
 0x42b   :  { %v1487_v59 = vsub.f32 0.0, %v1468_v15  ;;  %v1503_v35 = vmul.f32 1.442695, %v1489_v50  ;;  %v1672_v50 = vld [vmem:[#allocation6 + $0x14] sm:$0xf] }
 0x42c   :  { %v2371_v41 = vpop.f32.mrf.mxu0  ;;  %v2536_v39 = vpop.eup %2535  ;;  %v1673_v15 = vld [vmem:[#allocation6 + $0x34] sm:$0xf] }
 0x42d   :  { %v1499_v55 = vmul.f32 1.442695, %v1487_v59  ;;  %v1490_v30 = vsub.f32 0.0, %v2371_v41  ;;  %v2037_v59 = vcombine.low %v1672_v50, %v1673_v15 }
 0x42e   :  { %v1471_v4 = vpop.f32.mrf.mxu0  ;;  %v2538_v43 = vpop.eup %2537 }
 0x42f   :  { %2543 = vpow2.f32 %v1499_v55  ;;  %v1505_v6 = vmul.f32 1.442695, %v1490_v30  ;;  %v1488_v63 = vsub.f32 0.0, %v1471_v4 }
 0x430   :  { %v2540_v52 = vpop.eup %2539  ;;  %2545 = vpow2.f32 %v1503_v35 }
 0x431   :  { %v2542_v60 = vpop.eup %2541  ;;  %2547 = vpow2.f32 %v1505_v6  ;;  %v1501_v61 = vmul.f32 1.442695, %v1488_v63  ;;  %v1523_v48 = vpack.c.bf16 %v2540_v52, %v2536_v39  ;;  %v1694_v63 = vld [vmem:[#allocation6 + $0x50] sm:$0xf] }
 0x432   :  { %v1524_v3 = vpack.c.bf16 %v2538_v43, %v2542_v60  ;;  %v1697_v43 = vld [vmem:[#allocation6 + $0xb0] sm:$0xf]  ;;  %v2030_v52 = vcombine.low %v1694_v63, %v1695_v47 }
 0x433   :  { %2549 = vpow2.f32 %v1501_v61  ;;  %2388 = vmatprep.mubr.bf16.mxu1 %v1523_v48  ;;  %v2031_v6 = vcombine.low %v1696_v42, %v1697_v43  ;;  %v1692_v60 = vld [vmem:[#allocation6 + $0x10] sm:$0xf] }
 0x434   :  { %2389 = vmatmul.mubr.bf16.vlgmr.msra.gmra.mxu1 %v1524_v3  ;;  %v1693_v61 = vld [vmem:[#allocation6 + $0x30] sm:$0xf] }
 0x435   :  { %2421 = vmatpush3.bf16.msra.mxu1 %v3090_v5  ;;  %2406 = vmatprep.subr.bf16.mxu0 %v2031_v6  ;;  %v2029_v48 = vcombine.low %v1692_v60, %v1693_v61 }
 0x436   :  { %2422 = vmatprep.subr.bf16.mxu1 %v2043_v2  ;;  %2407 = vmatpush3.bf16.msra.mxu0 %v2031_v6 }
 0x437   :  { %2408 = vmatprep.subr.bf16.mxu0 %v2030_v52 }
 0x439   :  { %2423 = vmatpush3.bf16.msra.mxu1 %v2043_v2 }
 0x43a   :  { %2424 = vmatprep.subr.bf16.mxu1 %v2042_v13  ;;  %2409 = vmatpush3.bf16.msra.mxu0 %v2030_v52 }
 0x43b   :  { %2410 = vmatprep.subr.bf16.mxu0 %v2029_v48 }
 0x43c   :  { %v2544_v54 = vpop.eup %2543 }
 0x43d   :  { %v2546_v38 = vpop.eup %2545  ;;  %v1511_v1 = vadd.f32 1.0, %v2544_v54  ;;  %2425 = vmatpush3.bf16.msra.mxu1 %v2042_v13 }
 0x43e   :  { %v2548_v17 = vpop.eup %2547  ;;  %2426 = vmatprep.subr.bf16.mxu1 %v2041_v25  ;;  %v1513_v44 = vadd.f32 1.0, %v2546_v38  ;;  %2411 = vmatpush3.bf16.msra.mxu0 %v2029_v48 }
 0x43f   :  { %v1514_v28 = vadd.f32 1.0, %v2548_v17  ;;  %2551 = vrcp.f32 %v1511_v1 }
 0x440   :  { %v2550_v5 = vpop.eup %2549 }
 0x441   :  { %v1512_v45 = vadd.f32 1.0, %v2550_v5  ;;  %2427 = vmatpush3.bf16.msra.mxu1 %v2041_v25  ;;  %2553 = vrcp.f32 %v1514_v28 }
 0x442   :  { %2428 = vmatprep.subr.bf16.mxu1 %v2040_v23 }
 0x443   :  { %2555 = vrcp.f32 %v1512_v45 }
 0x444   :  { %2557 = vrcp.f32 %v1513_v44 }
 0x445   :  { %2429 = vmatpush3.bf16.msra.mxu1 %v2040_v23 }
 0x446   :  { %2430 = vmatprep.subr.bf16.mxu1 %v2039_v37 }
 0x449   :  { %2431 = vmatpush3.bf16.msra.mxu1 %v2039_v37 }
 0x44a   :  { %2432 = vmatprep.subr.bf16.mxu1 %v2038_v46 }
 0x44c   :  { %v2552_v35 = vpop.eup %2551 }
 0x44d   :  { %2433 = vmatpush3.bf16.msra.mxu1 %v2038_v46 }
 0x44e   :  { %2434 = vmatprep.subr.bf16.mxu1 %v2037_v59  ;;  %v2554_v41 = vpop.eup %2553 }
 0x450   :  { %v2556_v55 = vpop.eup %2555 }
 0x451   :  { %v2558_v30 = vpop.eup %2557  ;;  %v1525_v39 = vpack.c.bf16 %v2556_v55, %v2552_v35  ;;  %2435 = vmatpush3.bf16.msra.mxu1 %v2037_v59 }
 0x452   :  { %v1526_v4 = vpack.c.bf16 %v2554_v41, %v2558_v30 }
 0x453   :  { %2392 = vmatprep.mubr.bf16.mxu1 %v1525_v39 }
 0x454   :  { %2393 = vmatmul.mubr.bf16.gmra.mxu1 %v1526_v4 }
 0x455   :  { %2436 = vmatprep.mubr.bf16.mxu1 %v2834_v53 }
 0x45c   :  { %2437 = vmatmul.mubr.bf16.vlgmr.msra.gmra.mxu1 %v2855_v20 }
 0x45d   :  { %2440 = vmatprep.mubr.bf16.mxu1 %v2894_v49 }
 0x464   :  { %2441 = vmatmul.mubr.bf16.gmra.mxu1 %v2923_v9 }
 0x4f4   :  { %v2390_v53 = vpop.f32.mrf.mxu1 }
 0x4f5   :  { %v1658_v2 = vmul.f32 %v2390_v53, %v3054_v32 }
 0x4f6   :  { %v1625_v20 = vpop.f32.mrf.mxu1 }
 0x4f7   :  { %v1656_v9 = vmul.f32 %v1625_v20, %v3040_v0  ;;  %v1666_v25 = vadd.f32 %v1658_v2, %v3049_v58 }
 0x4f8   :  { %v2391_v49 = vpop.f32.mrf.mxu1 }
 0x4f9   :  { %v1659_v3 = vmul.f32 %v2391_v49, %v3058_v34  ;;  %v1664_v21 = vadd.f32 %v1656_v9, %v3034_v24 }
 0x4fa   :  { %v1628_v8 = vpop.f32.mrf.mxu1 }
 0x4fb   :  { %v1657_v12 = vmul.f32 %v1628_v8, %v3044_v10  ;;  %v1667_v13 = vadd.f32 %v1659_v3, %v3051_v31 }
 0x4fd   :  { %v1665_v16 = vadd.f32 %v1657_v12, %v3037_v56  ;;  %v1689_v27 = vpack.c.bf16 %v1667_v13, %v1666_v25 }
 0x4ff   :  { %v1688_v18 = vpack.c.bf16 %v1665_v16, %v1664_v21 }
 0x501   :  { %2412 = vmatprep.mubr.bf16.mxu0 %v1688_v18 }
 0x502   :  { %2413 = vmatmul.mubr.bf16.vlgmr.msra.gmra.mxu0 %v1689_v27 }
 0x514   :  { %v2394_v0 = vpop.f32.mrf.mxu1 }
 0x515   :  { %v1662_v10 = vmul.f32 %v2394_v0, %v3082_v19  ;;  %v2559_v19 = vld [vmem:[#allocation7] sm:$0xff] }
 0x516   :  { %v1641_v54 = vpop.f32.mrf.mxu1 }
 0x517   :  { %v1660_v32 = vmul.f32 %v1641_v54, %v3068_v14  ;;  %v1670_v17 = vadd.f32 %v1662_v10, %v3077_v51 }
 0x518   :  { %v2395_v34 = vpop.f32.mrf.mxu1 }
 0x519   :  { %v1663_v38 = vmul.f32 %v2395_v34, %v3086_v62  ;;  %v1668_v58 = vadd.f32 %v1660_v32, %v3063_v36  ;;  %v1936_v62 = vsub.s32 6, %v2815_v22 }
 0x51a   :  { %v1644_v31 = vpop.f32.mrf.mxu1 }
 0x51b   :  { %v1661_v24 = vmul.f32 %v1644_v31, %v3072_v11  ;;  %v1671_v56 = vadd.f32 %v1663_v38, %v3079_v57  ;;  %v1937_v26 = vrot.slane %v2559_v19, %v1936_v62 }
 0x51c   :  { %v2438_v14 = vpop.f32.mrf.mxu1 }
 0x51d   :  { %v1669_v1 = vadd.f32 %v1661_v24, %v3065_v40  ;;  %v1691_v28 = vpack.c.bf16 %v1671_v56, %v1670_v17 }
 0x51e   :  { %v1903_v33 = vpop.f32.mrf.mxu1 }
 0x51f   :  { %v1690_v23 = vpack.c.bf16 %v1669_v1, %v1668_v58 }
 0x520   :  { %v2439_v44 = vpop.f32.mrf.mxu1 }
 0x521   :  { %2416 = vmatprep.mubr.bf16.mxu0 %v1690_v23 }
 0x522   :  { %2417 = vmatmul.mubr.bf16.gmra.mxu0 %v1691_v28  ;;  %v1906_v29 = vpop.f32.mrf.mxu1 }
 0x524   :  { %v2442_v15 = vpop.f32.mrf.mxu1 }
 0x526   :  { %v1919_v59 = vpop.f32.mrf.mxu1 }
 0x528   :  { %v2443_v55 = vpop.f32.mrf.mxu1 }
 0x52a   :  { %v1922_v63 = vpop.f32.mrf.mxu1 }
 0x5c2   :  { %v2414_v5 = vpop.f32.mrf.mxu0 }
 0x5c3   :  { %v1912_v11 = vadd.f32 %v2438_v14, %v2414_v5 }
 0x5c4   :  { %v1790_v57 = vpop.f32.mrf.mxu0 }
 0x5c5   :  { %v1940_v45 = vadd.f32 %v1937_v26, %v1912_v11  ;;  %v1904_v36 = vadd.f32 %v1903_v33, %v1790_v57 }
 0x5c6   :  { %v2415_v37 = vpop.f32.mrf.mxu0 }
 0x5c7   :  { %1948 = vst [vmem:[%s3143_s4 + $0xe] sm:$0xfc] %v1940_v45  ;;  %v1938_v40 = vadd.f32 %v1937_v26, %v1904_v36  ;;  %v1915_v51 = vadd.f32 %v2439_v44, %v2415_v37 }
 0x5c8   :  { %v1793_v7 = vpop.f32.mrf.mxu0 }
 0x5c9   :  { %1946 = vst [vmem:[%s3143_s4 - $0x2] sm:$0xfc] %v1938_v40  ;;  %v1941_v22 = vadd.f32 %v1937_v26, %v1915_v51  ;;  %v1907_v46 = vadd.f32 %v1906_v29, %v1793_v7 }
 0x5cb   :  { %1949 = vst [vmem:[%s3143_s4 + $0x16] sm:$0xff] %v1941_v22  ;;  %v1939_v50 = vadd.f32 %v1937_v26, %v1907_v46 }
 0x5cd   :  { %1947 = vst [vmem:[%s3143_s4 + $0x6] sm:$0xff] %v1939_v50 }
 0x5e2   :  { %v2418_v35 = vpop.f32.mrf.mxu0 }
 0x5e3   :  { %v1928_v41 = vadd.f32 %v2442_v15, %v2418_v35 }
 0x5e4   :  { %v1806_v30 = vpop.f32.mrf.mxu0 }
 0x5e5   :  { %v1944_v39 = vadd.f32 %v1937_v26, %v1928_v41  ;;  %v1920_v4 = vadd.f32 %v1919_v59, %v1806_v30 }
 0x5e6   :  { %v2419_v42 = vpop.f32.mrf.mxu0 }
 0x5e7   :  { %1952 = vst [vmem:[%s3143_s4 + $0x2e] sm:$0xfc] %v1944_v39  ;;  %v1942_v43 = vadd.f32 %v1937_v26, %v1920_v4  ;;  %v1931_v6 = vadd.f32 %v2443_v55, %v2419_v42 }
 0x5e8   :  { %v1809_v47 = vpop.f32.mrf.mxu0 }
 0x5e9   :  { %1950 = vst [vmem:[%s3143_s4 + $0x1e] sm:$0xfc] %v1942_v43  ;;  %v1945_v52 = vadd.f32 %v1937_v26, %v1931_v6  ;;  %v1923_v60 = vadd.f32 %v1922_v63, %v1809_v47 }
 0x5eb   :  { %1953 = vst [vmem:[%s3143_s4 + $0x36] sm:$0xff] %v1945_v52  ;;  %v1943_v61 = vadd.f32 %v1937_v26, %v1923_v60 }
 0x5ed   :  { %1951 = vst [vmem:[%s3143_s4 + $0x26] sm:$0xff] %v1943_v61 }
 0x5ee   :  { %1958 = vsyncpa [#allocation3], 1 }
 0x5ef   :  { %1959 = vsyncpa [#allocation5], 1 }
 0x5f0   :  { %1960 = vsyncpa [#allocation8], 1 }

</bundles_post_ra>
